<compile_context>
chip_gen: v6e
topology: v6e:2x2x1
jax: 0.10.0
libtpu: 0.0.40
codegen_flags: <defaults>
</compile_context>

<pallas_src>
import functools

import jax
import jax.numpy as jnp
from jax.experimental import pallas as pl
from jax.experimental.pallas import tpu as pltpu

EPS = 1e-5
EXPANSION = 4
MXU_DTYPE = jnp.bfloat16   # matmul operand / intermediate dtype; accumulation stays f32

# Tile ceilings.  Worst case (TM=512, TK=1024, TN=512) double-buffered operands +
# f32 accumulator is ~8 MiB of VMEM: safe under default scoped VMEM on
# v5e (16 MiB), v6e (32 MiB) and v7x (32 MiB scoped / 64 MiB physical).
TM_MAX = 512
TN_MAX = 512
TK_MAX = 512           # per-step K tile when K has to be split
TK_SINGLE_MAX = 1024   # up to this, run the whole K reduction in one grid step


def _round_up(x, m):
    return (x + m - 1) // m * m


# ----------------------------- Pallas kernel ------------------------------- #

def _mm_bias_kernel(x_ref, w_ref, bias_ref, *rest, relu, has_res):
    """Tiled (TM,TK)@(TK,TN) matmul with f32 accumulator scratch.

    BN scale is pre-folded into the weight columns, so the epilogue (only at
    k == last) is bias add (+ residual add in f32) (+ ReLU) + one store; the
    K-loop critical path is pure MXU work.
    """
    if has_res:
        res_ref, o_ref, acc_ref = rest
    else:
        o_ref, acc_ref = rest
        res_ref = None

    k = pl.program_id(2)

    @pl.when(k == 0)
    def _init():
        acc_ref[...] = jnp.zeros_like(acc_ref)

    acc_ref[...] += jnp.dot(x_ref[...], w_ref[...],
                            preferred_element_type=jnp.float32)

    @pl.when(k == pl.num_programs(2) - 1)
    def _epilogue():
        y = acc_ref[...] + bias_ref[...]
        if res_ref is not None:
            y = y + res_ref[...].astype(jnp.float32)   # residual add in f32
        if relu:
            y = jnp.maximum(y, 0.0)
        o_ref[...] = y.astype(o_ref.dtype)


def _pallas_mm_bn(x2d, wm, scale, bias, res2d=None, relu=True,
                  out_dtype=MXU_DTYPE):
    """(M,K)@(K,N) matmul with fused folded-BN (+residual add)(+ReLU)."""
    M, K = x2d.shape
    Kw, N = wm.shape
    assert K == Kw

    # Fold BN scale into the weight columns (in f32), cast to bf16 once below.
    wm = wm.astype(jnp.float32) * scale.astype(jnp.float32)[None, :]

    # --- tile selection ----------------------------------------------------- #
    # K: single reduction step when it fits comfortably (drops per-tile
    # init/epilogue overhead and avoids the old round_up(K, 512) blowup),
    # otherwise near-even 128-multiple chunks.
    Kp = _round_up(K, 128)
    if Kp <= TK_SINGLE_MAX:
        TK = Kp
    else:
        nk = -(-Kp // TK_MAX)
        TK = _round_up(-(-Kp // nk), 128)
        Kp = _round_up(K, TK)

    TN = min(TN_MAX, _round_up(N, 128))
    Np = _round_up(N, TN)

    TM = min(TM_MAX, _round_up(M, 16))     # multiple of 16: bf16 sublane packing
    Mp = _round_up(M, TM)
    # v7x megacore: make sure the parallel grid has >= 2 blocks when possible,
    # so both TensorCores get work.  No-op effect on v5e/v6e (single TC).
    if (Mp // TM) * (Np // TN) < 2 and TM > 16:
        TM = max(16, _round_up(TM // 2, 16))
        Mp = _round_up(M, TM)

    # --- operand prep (bf16 operands; zero padding is exact) ---------------- #
    xp = jnp.pad(x2d.astype(MXU_DTYPE), ((0, Mp - M), (0, Kp - K)))
    wp = jnp.pad(wm.astype(MXU_DTYPE), ((0, Kp - K), (0, Np - N)))
    bp = jnp.pad(bias.astype(jnp.float32).reshape(1, N), ((0, 0), (0, Np - N)))

    args = [xp, wp, bp]
    in_specs = [
        pl.BlockSpec((TM, TK), lambda i, j, k: (i, k)),
        pl.BlockSpec((TK, TN), lambda i, j, k: (k, j)),
        pl.BlockSpec((1, TN), lambda i, j, k: (0, j)),   # bias: per-N tile
    ]

    has_res = res2d is not None
    res_bytes = 0
    if has_res:
        # Residual streamed as bf16 (half the HBM read); added in f32 in-kernel.
        rp = jnp.pad(res2d.astype(MXU_DTYPE), ((0, Mp - M), (0, Np - N)))
        args.append(rp)
        in_specs.append(pl.BlockSpec((TM, TN), lambda i, j, k: (i, j)))
        res_bytes = Mp * Np * 2

    grid = (Mp // TM, Np // TN, Kp // TK)
    kernel = functools.partial(_mm_bias_kernel, relu=relu, has_res=has_res)

    out_itemsize = jnp.dtype(out_dtype).itemsize
    cost = pl.CostEstimate(
        flops=2 * Mp * Np * Kp,
        transcendentals=0,
        bytes_accessed=(xp.size * 2 + wp.size * 2
                        + Mp * Np * out_itemsize + res_bytes),
    )

    out = pl.pallas_call(
        kernel,
        out_shape=jax.ShapeDtypeStruct((Mp, Np), out_dtype),
        grid=grid,
        in_specs=in_specs,
        out_specs=pl.BlockSpec((TM, TN), lambda i, j, k: (i, j)),
        scratch_shapes=[pltpu.VMEM((TM, TN), jnp.float32)],
        compiler_params=pltpu.CompilerParams(
            dimension_semantics=("parallel", "parallel", "arbitrary")),
        cost_estimate=cost,
    )(*args)

    if Mp != M or Np != N:
        # TODO(synk): carry the channel-padded (Mp, Np) layout between convs
        # instead of slicing here and re-padding in the next conv's wrapper.
        out = out[:M, :N]
    return out


# ------------------------- conv helpers (glue + kernel) --------------------- #

def _bn_fold(gamma, beta, mean, var):
    scale = gamma / jnp.sqrt(var + EPS)
    bias = beta - mean * scale
    return scale, bias


def conv1x1_bn(x_nhwc, w_oihw, scale, bias, stride=1, relu=True,
               res2d=None, out_dtype=MXU_DTYPE):
    """1x1 conv (bias=False) + BN (+residual add)(+ReLU).  w_oihw: (Cout,Cin,1,1)."""
    if stride > 1:
        # TODO(synk): fold the stride-2 subsampling into the x BlockSpec
        # index_map (strided DMA) instead of materializing a strided copy.
        x_nhwc = x_nhwc[:, ::stride, ::stride, :]
    N, H, W, Cin = x_nhwc.shape
    Cout = w_oihw.shape[0]
    x2d = x_nhwc.reshape(N * H * W, Cin)
    wm = w_oihw.reshape(Cout, Cin).T  # (Cin, Cout)
    y2d = _pallas_mm_bn(x2d, wm, scale, bias, res2d=res2d, relu=relu,
                        out_dtype=out_dtype)
    return y2d.reshape(N, H, W, Cout)


def conv3x3_bn_relu(x_nhwc, w_oihw, scale, bias, stride=1):
    """3x3 conv, padding=1 (bias=False) + BN + ReLU via im2col + tiled matmul."""
    N, H, W, Cin = x_nhwc.shape
    Cout = w_oihw.shape[0]
    xp = jnp.pad(x_nhwc, ((0, 0), (1, 1), (1, 1), (0, 0)))
    Ho = (H + 2 - 3) // stride + 1
    Wo = (W + 2 - 3) // stride + 1
    # TODO(synk): move the 9 taps onto the K grid axis (shifted-window DMA of the
    # padded NHWC input) instead of materializing the im2col slab; at least it
    # is built in bf16 here since the producing conv already emits bf16.
    patches = []
    for dh in range(3):
        for dw in range(3):
            patches.append(
                xp[:, dh:dh + (Ho - 1) * stride + 1:stride,
                      dw:dw + (Wo - 1) * stride + 1:stride, :]
            )
    # tap-major, channel-minor ordering -> (N*Ho*Wo, 9*Cin)
    xcol = jnp.concatenate(patches, axis=-1).reshape(N * Ho * Wo, 9 * Cin)
    # weight (Cout, Cin, kh, kw) -> (kh, kw, Cin, Cout) -> (9*Cin, Cout)
    wm = jnp.transpose(w_oihw, (2, 3, 1, 0)).reshape(9 * Cin, Cout)
    y2d = _pallas_mm_bn(xcol, wm, scale, bias, relu=True)
    return y2d.reshape(N, Ho, Wo, Cout)


# ------------------------------- BottleNeck -------------------------------- #

def init_bottleneck_params(key, in_channels, out_channels, stride=1):
    exp_out = out_channels * EXPANSION
    keys = jax.random.split(key, 16)

    def conv_w(k, cout, cin, kh, kw):
        fan_in = cin * kh * kw
        return jax.random.normal(k, (cout, cin, kh, kw), jnp.float32) / jnp.sqrt(fan_in)

    def bn(k, c):
        kg, kb, km, kv = jax.random.split(k, 4)
        gamma = 1.0 + 0.1 * jax.random.normal(kg, (c,), jnp.float32)
        beta = 0.1 * jax.random.normal(kb, (c,), jnp.float32)
        mean = 0.1 * jax.random.normal(km, (c,), jnp.float32)
        var = 1.0 + 0.1 * jax.random.uniform(kv, (c,), jnp.float32)
        return gamma, beta, mean, var

    p = {
        "w1": conv_w(keys[0], out_channels, in_channels, 1, 1),
        "bn1": bn(keys[1], out_channels),
        "w2": conv_w(keys[2], out_channels, out_channels, 3, 3),
        "bn2": bn(keys[3], out_channels),
        "w3": conv_w(keys[4], exp_out, out_channels, 1, 1),
        "bn3": bn(keys[5], exp_out),
        "stride": stride,
    }
    if stride != 1 or in_channels != exp_out:
        p["ws"] = conv_w(keys[6], exp_out, in_channels, 1, 1)
        p["bns"] = bn(keys[7], exp_out)
    return p


def bottleneck_forward(params, x_nchw):
    # layout: NCHW in/out; NHWC internally.
    x = jnp.transpose(x_nchw, (0, 2, 3, 1))
    stride = params["stride"]

    s1, b1 = _bn_fold(*params["bn1"])
    s2, b2 = _bn_fold(*params["bn2"])
    s3, b3 = _bn_fold(*params["bn3"])

    # shortcut branch (bf16 output; re-read once by the final conv's epilogue)
    if "ws" in params:
        ss, bs = _bn_fold(*params["bns"])
        shortcut = conv1x1_bn(x, params["ws"], ss, bs, stride=stride, relu=False)
    else:
        shortcut = x
    sc2d = shortcut.reshape(-1, shortcut.shape[-1])

    # residual branch
    # TODO(synk): keep the conv1 -> conv3 intermediates VMEM-resident (single
    # fused pallas_call per branch) instead of HBM round-trips between convs.
    h = conv1x1_bn(x, params["w1"], s1, b1, stride=1, relu=True)
    h = conv3x3_bn_relu(h, params["w2"], s2, b2, stride=stride)
    # final 1x1 conv + BN + shortcut add + FINAL ReLU fused in the epilogue
    # (relu=True here is the fix: the module applies ReLU(residual + shortcut)).
    y = conv1x1_bn(h, params["w3"], s3, b3, stride=1, relu=True,
                   res2d=sc2d, out_dtype=jnp.float32)

    return jnp.transpose(y, (0, 3, 1, 2))


# ------------------------------ pure-JAX reference -------------------------- #
# Precision-matched: the reference also feeds bf16 operands to its convs with
# f32 accumulation, mirroring the kernel's MXU dtype.

def _ref_conv(x_nhwc, w_oihw, stride, padding):
    w = jnp.transpose(w_oihw, (2, 3, 1, 0))  # HWIO
    return jax.lax.conv_general_dilated(
        x_nhwc.astype(MXU_DTYPE), w.astype(MXU_DTYPE),
        window_strides=(stride, stride), padding=padding,
        dimension_numbers=("NHWC", "HWIO", "NHWC"),
        preferred_element_type=jnp.float32)


def _ref_bn(x, gamma, beta, mean, var):
    return (x - mean) / jnp.sqrt(var + EPS) * gamma + beta


def bottleneck_reference(params, x_nchw):
    x = jnp.transpose(x_nchw, (0, 2, 3, 1))
    stride = params["stride"]
    h = jax.nn.relu(_ref_bn(_ref_conv(x, params["w1"], 1, "VALID"), *params["bn1"]))
    h = jax.nn.relu(_ref_bn(_ref_conv(h, params["w2"], stride, [(1, 1), (1, 1)]),
                            *params["bn2"]))
    h = _ref_bn(_ref_conv(h, params["w3"], 1, "VALID"), *params["bn3"])
    if "ws" in params:
        sc = _ref_bn(_ref_conv(x, params["ws"], stride, "VALID"), *params["bns"])
    else:
        sc = x
    y = jax.nn.relu(h + sc)
    return jnp.transpose(y, (0, 3, 1, 2))


# ----------------------------------- main ----------------------------------- #

if __name__ == "__main__":
    key = jax.random.PRNGKey(0)
    k_x, k_p, k_x2, k_p2 = jax.random.split(key, 4)

    # config 1: batch=2, in_channels=4, spatial=16x16, out_channels=4 (-> 16), stride=1
    N, Cin, H, W = 2, 4, 16, 16
    out_channels, stride = 4, 1
    x = jax.random.normal(k_x, (N, Cin, H, W), jnp.float32)
    params = init_bottleneck_params(k_p, Cin, out_channels, stride=stride)

    fwd = jax.jit(lambda xx: bottleneck_forward(params, xx))
    y = jax.block_until_ready(fwd(x))
    y_ref = jax.block_until_ready(bottleneck_reference(params, x))
    assert y.shape == y_ref.shape == (N, out_channels * EXPANSION, H // stride, W // stride)
    err1 = float(jnp.max(jnp.abs(y - y_ref)))
    assert jnp.allclose(y, y_ref, rtol=2e-2, atol=2e-2), err1

    # config 2: strided block (stride=2) with projection shortcut
    N2, Cin2, H2, W2 = 2, 16, 16, 16
    out_channels2, stride2 = 4, 2
    x2 = jax.random.normal(k_x2, (N2, Cin2, H2, W2), jnp.float32)
    params2 = init_bottleneck_params(k_p2, Cin2, out_channels2, stride=stride2)

    fwd2 = jax.jit(lambda xx: bottleneck_forward(params2, xx))
    y2 = jax.block_until_ready(fwd2(x2))
    y2_ref = jax.block_until_ready(bottleneck_reference(params2, x2))
    assert y2.shape == y2_ref.shape == (N2, out_channels2 * EXPANSION, H2 // stride2, W2 // stride2)
    err2 = float(jnp.max(jnp.abs(y2 - y2_ref)))
    assert jnp.allclose(y2, y2_ref, rtol=2e-2, atol=2e-2), err2

    print("KERNEL_OK")
</pallas_src>

<mosaic_0001>
module attributes {stable_mosaic.version = 11 : i64} {
  func.func @_mm_bias_kernel(%arg0: i32, %arg1: i32, %arg2: i32, %arg3: memref<256x128xbf16, #tpu.memory_space<vmem>>, %arg4: memref<128x128xbf16, #tpu.memory_space<vmem>>, %arg5: memref<1x128xf32, #tpu.memory_space<vmem>>, %arg6: memref<256x128xbf16, #tpu.memory_space<vmem>>, %arg7: memref<256x128xf32, #tpu.memory_space<vmem>>) attributes {dimension_semantics = [#tpu.dimension_semantics<parallel>, #tpu.dimension_semantics<parallel>, #tpu.dimension_semantics<arbitrary>], iteration_bounds = array<i64: 2, 1, 1>, scalar_prefetch = 0 : i64, scratch_operands = 1 : i64, tpu.core_type = #tpu.core_type<tc>, window_params = [{transform_indices = @transform_0, window_bounds = array<i64: 256, 128>}, {transform_indices = @transform_1, window_bounds = array<i64: 128, 128>}, {transform_indices = @transform_2, window_bounds = array<i64: 1, 128>}, {transform_indices = @transform_3, window_bounds = array<i64: 256, 128>}]} {
    %c0_i32 = arith.constant 0 : i32
    %0 = arith.cmpi eq, %arg2, %c0_i32 : i32
    %1 = arith.extui %0 : i1 to i32
    %c0_i32_0 = arith.constant 0 : i32
    %2 = arith.cmpi ne, %1, %c0_i32_0 : i32
    scf.if %2 {
      %cst_10 = arith.constant 0.000000e+00 : f32
      %12 = vector.broadcast %cst_10 : f32 to vector<256x128xf32>
      %c0_11 = arith.constant 0 : index
      %c0_12 = arith.constant 0 : index
      %13 = vector.load %arg7[%c0_11, %c0_12] : memref<256x128xf32, #tpu.memory_space<vmem>>, vector<256x128xf32>
      tpu.vector_store %arg7[%c0_11, %c0_12], %12 {strides = array<i32>} : memref<256x128xf32, #tpu.memory_space<vmem>>, vector<256x128xf32>,
    } else {
    }
    %c0 = arith.constant 0 : index
    %c0_1 = arith.constant 0 : index
    %3 = vector.load %arg7[%c0, %c0_1] : memref<256x128xf32, #tpu.memory_space<vmem>>, vector<256x128xf32>
    %c0_2 = arith.constant 0 : index
    %c0_3 = arith.constant 0 : index
    %4 = vector.load %arg3[%c0_2, %c0_3] : memref<256x128xbf16, #tpu.memory_space<vmem>>, vector<256x128xbf16>
    %c0_4 = arith.constant 0 : index
    %c0_5 = arith.constant 0 : index
    %5 = vector.load %arg4[%c0_4, %c0_5] : memref<128x128xbf16, #tpu.memory_space<vmem>>, vector<128x128xbf16>
    %cst = arith.constant dense<0.000000e+00> : vector<256x128xf32>
    %6 = tpu.matmul %4, %5, %cst {dimension_numbers = #tpu.dot_dimension_numbers<[1], [0], [0], [1], [0, 0, 1, 1], [], []>} : vector<256x128xbf16>, vector<128x128xbf16>, vector<256x128xf32> -> vector<256x128xf32>
    %7 = arith.addf %3, %6 : vector<256x128xf32>
    %c0_6 = arith.constant 0 : index
    %c0_7 = arith.constant 0 : index
    %8 = vector.load %arg7[%c0_6, %c0_7] : memref<256x128xf32, #tpu.memory_space<vmem>>, vector<256x128xf32>
    tpu.vector_store %arg7[%c0_6, %c0_7], %7 {strides = array<i32>} : memref<256x128xf32, #tpu.memory_space<vmem>>, vector<256x128xf32>,
    %c0_i32_8 = arith.constant 0 : i32
    %9 = arith.cmpi eq, %arg2, %c0_i32_8 : i32
    %10 = arith.extui %9 : i1 to i32
    %c0_i32_9 = arith.constant 0 : i32
    %11 = arith.cmpi ne, %10, %c0_i32_9 : i32
    scf.if %11 {
      %c0_10 = arith.constant 0 : index
      %c0_11 = arith.constant 0 : index
      %12 = vector.load %arg7[%c0_10, %c0_11] : memref<256x128xf32, #tpu.memory_space<vmem>>, vector<256x128xf32>
      %c0_12 = arith.constant 0 : index
      %c0_13 = arith.constant 0 : index
      %13 = vector.load %arg5[%c0_12, %c0_13] : memref<1x128xf32, #tpu.memory_space<vmem>>, vector<1x128xf32>
      %14 = vector.broadcast %13 : vector<1x128xf32> to vector<256x128xf32>
      %15 = arith.addf %12, %14 : vector<256x128xf32>
      %16 = arith.truncf %15 : vector<256x128xf32> to vector<256x128xbf16>
      %c0_14 = arith.constant 0 : index
      %c0_15 = arith.constant 0 : index
      %17 = vector.load %arg6[%c0_14, %c0_15] : memref<256x128xbf16, #tpu.memory_space<vmem>>, vector<256x128xbf16>
      tpu.vector_store %arg6[%c0_14, %c0_15], %16 {strides = array<i32>} : memref<256x128xbf16, #tpu.memory_space<vmem>>, vector<256x128xbf16>,
    } else {
    }
    return
  }
  func.func @transform_0(%arg0: i32, %arg1: i32, %arg2: i32) -> (i32, i32) {
    %c0_i32 = arith.constant 0 : i32
    return %arg0, %arg2 : i32, i32
  }
  func.func @transform_1(%arg0: i32, %arg1: i32, %arg2: i32) -> (i32, i32) {
    %c0_i32 = arith.constant 0 : i32
    return %arg2, %arg1 : i32, i32
  }
  func.func @transform_2(%arg0: i32, %arg1: i32, %arg2: i32) -> (i32, i32) {
    %c0_i32 = arith.constant 0 : i32
    %c0_i32_0 = arith.constant 0 : i32
    return %c0_i32, %arg1 : i32, i32
  }
  func.func @transform_3(%arg0: i32, %arg1: i32, %arg2: i32) -> (i32, i32) {
    %c0_i32 = arith.constant 0 : i32
    return %arg0, %arg1 : i32, i32
  }
}

module attributes {stable_mosaic.version = 11 : i64} {
  func.func @_mm_bias_kernel(%arg0: i32, %arg1: i32, %arg2: i32, %arg3: memref<256x128xbf16, #tpu.memory_space<vmem>>, %arg4: memref<128x128xbf16, #tpu.memory_space<vmem>>, %arg5: memref<1x128xf32, #tpu.memory_space<vmem>>, %arg6: memref<256x128xbf16, #tpu.memory_space<vmem>>, %arg7: memref<256x128xf32, #tpu.memory_space<vmem>>) attributes {dimension_semantics = [#tpu.dimension_semantics<parallel>, #tpu.dimension_semantics<parallel>, #tpu.dimension_semantics<arbitrary>], iteration_bounds = array<i64: 2, 1, 1>, scalar_prefetch = 0 : i64, scratch_operands = 1 : i64, tpu.core_type = #tpu.core_type<tc>, window_params = [{transform_indices = @transform_0, window_bounds = array<i64: 256, 128>}, {transform_indices = @transform_1, window_bounds = array<i64: 128, 128>}, {transform_indices = @transform_2, window_bounds = array<i64: 1, 128>}, {transform_indices = @transform_3, window_bounds = array<i64: 256, 128>}]} {
    %c0_i32 = arith.constant 0 : i32
    %0 = arith.cmpi eq, %arg2, %c0_i32 : i32
    %1 = arith.extui %0 : i1 to i32
    %c0_i32_0 = arith.constant 0 : i32
    %2 = arith.cmpi ne, %1, %c0_i32_0 : i32
    scf.if %2 {
      %cst_10 = arith.constant 0.000000e+00 : f32
      %12 = vector.broadcast %cst_10 : f32 to vector<256x128xf32>
      %c0_11 = arith.constant 0 : index
      %c0_12 = arith.constant 0 : index
      %13 = vector.load %arg7[%c0_11, %c0_12] : memref<256x128xf32, #tpu.memory_space<vmem>>, vector<256x128xf32>
      tpu.vector_store %arg7[%c0_11, %c0_12], %12 {strides = array<i32>} : memref<256x128xf32, #tpu.memory_space<vmem>>, vector<256x128xf32>,
    } else {
    }
    %c0 = arith.constant 0 : index
    %c0_1 = arith.constant 0 : index
    %3 = vector.load %arg7[%c0, %c0_1] : memref<256x128xf32, #tpu.memory_space<vmem>>, vector<256x128xf32>
    %c0_2 = arith.constant 0 : index
    %c0_3 = arith.constant 0 : index
    %4 = vector.load %arg3[%c0_2, %c0_3] : memref<256x128xbf16, #tpu.memory_space<vmem>>, vector<256x128xbf16>
    %c0_4 = arith.constant 0 : index
    %c0_5 = arith.constant 0 : index
    %5 = vector.load %arg4[%c0_4, %c0_5] : memref<128x128xbf16, #tpu.memory_space<vmem>>, vector<128x128xbf16>
    %cst = arith.constant dense<0.000000e+00> : vector<256x128xf32>
    %6 = tpu.matmul %4, %5, %cst {dimension_numbers = #tpu.dot_dimension_numbers<[1], [0], [0], [1], [0, 0, 1, 1], [], []>} : vector<256x128xbf16>, vector<128x128xbf16>, vector<256x128xf32> -> vector<256x128xf32>
    %7 = arith.addf %3, %6 : vector<256x128xf32>
    %c0_6 = arith.constant 0 : index
    %c0_7 = arith.constant 0 : index
    %8 = vector.load %arg7[%c0_6, %c0_7] : memref<256x128xf32, #tpu.memory_space<vmem>>, vector<256x128xf32>
    tpu.vector_store %arg7[%c0_6, %c0_7], %7 {strides = array<i32>} : memref<256x128xf32, #tpu.memory_space<vmem>>, vector<256x128xf32>,
    %c0_i32_8 = arith.constant 0 : i32
    %9 = arith.cmpi eq, %arg2, %c0_i32_8 : i32
    %10 = arith.extui %9 : i1 to i32
    %c0_i32_9 = arith.constant 0 : i32
    %11 = arith.cmpi ne, %10, %c0_i32_9 : i32
    scf.if %11 {
      %c0_10 = arith.constant 0 : index
      %c0_11 = arith.constant 0 : index
      %12 = vector.load %arg7[%c0_10, %c0_11] : memref<256x128xf32, #tpu.memory_space<vmem>>, vector<256x128xf32>
      %c0_12 = arith.constant 0 : index
      %c0_13 = arith.constant 0 : index
      %13 = vector.load %arg5[%c0_12, %c0_13] : memref<1x128xf32, #tpu.memory_space<vmem>>, vector<1x128xf32>
      %14 = vector.broadcast %13 : vector<1x128xf32> to vector<256x128xf32>
      %15 = arith.addf %12, %14 : vector<256x128xf32>
      %cst_14 = arith.constant 0.000000e+00 : f32
      %16 = vector.broadcast %cst_14 : f32 to vector<256x128xf32>
      %17 = arith.maximumf %15, %16 : vector<256x128xf32>
      %18 = arith.truncf %17 : vector<256x128xf32> to vector<256x128xbf16>
      %c0_15 = arith.constant 0 : index
      %c0_16 = arith.constant 0 : index
      %19 = vector.load %arg6[%c0_15, %c0_16] : memref<256x128xbf16, #tpu.memory_space<vmem>>, vector<256x128xbf16>
      tpu.vector_store %arg6[%c0_15, %c0_16], %18 {strides = array<i32>} : memref<256x128xbf16, #tpu.memory_space<vmem>>, vector<256x128xbf16>,
    } else {
    }
    return
  }
  func.func @transform_0(%arg0: i32, %arg1: i32, %arg2: i32) -> (i32, i32) {
    %c0_i32 = arith.constant 0 : i32
    return %arg0, %arg2 : i32, i32
  }
  func.func @transform_1(%arg0: i32, %arg1: i32, %arg2: i32) -> (i32, i32) {
    %c0_i32 = arith.constant 0 : i32
    return %arg2, %arg1 : i32, i32
  }
  func.func @transform_2(%arg0: i32, %arg1: i32, %arg2: i32) -> (i32, i32) {
    %c0_i32 = arith.constant 0 : i32
    %c0_i32_0 = arith.constant 0 : i32
    return %c0_i32, %arg1 : i32, i32
  }
  func.func @transform_3(%arg0: i32, %arg1: i32, %arg2: i32) -> (i32, i32) {
    %c0_i32 = arith.constant 0 : i32
    return %arg0, %arg1 : i32, i32
  }
}

module attributes {stable_mosaic.version = 11 : i64} {
  func.func @_mm_bias_kernel(%arg0: i32, %arg1: i32, %arg2: i32, %arg3: memref<256x128xbf16, #tpu.memory_space<vmem>>, %arg4: memref<128x128xbf16, #tpu.memory_space<vmem>>, %arg5: memref<1x128xf32, #tpu.memory_space<vmem>>, %arg6: memref<256x128xbf16, #tpu.memory_space<vmem>>, %arg7: memref<256x128xf32, #tpu.memory_space<vmem>>, %arg8: memref<256x128xf32, #tpu.memory_space<vmem>>) attributes {dimension_semantics = [#tpu.dimension_semantics<parallel>, #tpu.dimension_semantics<parallel>, #tpu.dimension_semantics<arbitrary>], iteration_bounds = array<i64: 2, 1, 1>, scalar_prefetch = 0 : i64, scratch_operands = 1 : i64, tpu.core_type = #tpu.core_type<tc>, window_params = [{transform_indices = @transform_0, window_bounds = array<i64: 256, 128>}, {transform_indices = @transform_1, window_bounds = array<i64: 128, 128>}, {transform_indices = @transform_2, window_bounds = array<i64: 1, 128>}, {transform_indices = @transform_3, window_bounds = array<i64: 256, 128>}, {transform_indices = @transform_4, window_bounds = array<i64: 256, 128>}]} {
    %c0_i32 = arith.constant 0 : i32
    %0 = arith.cmpi eq, %arg2, %c0_i32 : i32
    %1 = arith.extui %0 : i1 to i32
    %c0_i32_0 = arith.constant 0 : i32
    %2 = arith.cmpi ne, %1, %c0_i32_0 : i32
    scf.if %2 {
      %cst_10 = arith.constant 0.000000e+00 : f32
      %12 = vector.broadcast %cst_10 : f32 to vector<256x128xf32>
      %c0_11 = arith.constant 0 : index
      %c0_12 = arith.constant 0 : index
      %13 = vector.load %arg8[%c0_11, %c0_12] : memref<256x128xf32, #tpu.memory_space<vmem>>, vector<256x128xf32>
      tpu.vector_store %arg8[%c0_11, %c0_12], %12 {strides = array<i32>} : memref<256x128xf32, #tpu.memory_space<vmem>>, vector<256x128xf32>,
    } else {
    }
    %c0 = arith.constant 0 : index
    %c0_1 = arith.constant 0 : index
    %3 = vector.load %arg8[%c0, %c0_1] : memref<256x128xf32, #tpu.memory_space<vmem>>, vector<256x128xf32>
    %c0_2 = arith.constant 0 : index
    %c0_3 = arith.constant 0 : index
    %4 = vector.load %arg3[%c0_2, %c0_3] : memref<256x128xbf16, #tpu.memory_space<vmem>>, vector<256x128xbf16>
    %c0_4 = arith.constant 0 : index
    %c0_5 = arith.constant 0 : index
    %5 = vector.load %arg4[%c0_4, %c0_5] : memref<128x128xbf16, #tpu.memory_space<vmem>>, vector<128x128xbf16>
    %cst = arith.constant dense<0.000000e+00> : vector<256x128xf32>
    %6 = tpu.matmul %4, %5, %cst {dimension_numbers = #tpu.dot_dimension_numbers<[1], [0], [0], [1], [0, 0, 1, 1], [], []>} : vector<256x128xbf16>, vector<128x128xbf16>, vector<256x128xf32> -> vector<256x128xf32>
    %7 = arith.addf %3, %6 : vector<256x128xf32>
    %c0_6 = arith.constant 0 : index
    %c0_7 = arith.constant 0 : index
    %8 = vector.load %arg8[%c0_6, %c0_7] : memref<256x128xf32, #tpu.memory_space<vmem>>, vector<256x128xf32>
    tpu.vector_store %arg8[%c0_6, %c0_7], %7 {strides = array<i32>} : memref<256x128xf32, #tpu.memory_space<vmem>>, vector<256x128xf32>,
    %c0_i32_8 = arith.constant 0 : i32
    %9 = arith.cmpi eq, %arg2, %c0_i32_8 : i32
    %10 = arith.extui %9 : i1 to i32
    %c0_i32_9 = arith.constant 0 : i32
    %11 = arith.cmpi ne, %10, %c0_i32_9 : i32
    scf.if %11 {
      %c0_10 = arith.constant 0 : index
      %c0_11 = arith.constant 0 : index
      %12 = vector.load %arg8[%c0_10, %c0_11] : memref<256x128xf32, #tpu.memory_space<vmem>>, vector<256x128xf32>
      %c0_12 = arith.constant 0 : index
      %c0_13 = arith.constant 0 : index
      %13 = vector.load %arg5[%c0_12, %c0_13] : memref<1x128xf32, #tpu.memory_space<vmem>>, vector<1x128xf32>
      %14 = vector.broadcast %13 : vector<1x128xf32> to vector<256x128xf32>
      %15 = arith.addf %12, %14 : vector<256x128xf32>
      %c0_14 = arith.constant 0 : index
      %c0_15 = arith.constant 0 : index
      %16 = vector.load %arg6[%c0_14, %c0_15] : memref<256x128xbf16, #tpu.memory_space<vmem>>, vector<256x128xbf16>
      %17 = arith.extf %16 : vector<256x128xbf16> to vector<256x128xf32>
      %18 = arith.addf %15, %17 : vector<256x128xf32>
      %cst_16 = arith.constant 0.000000e+00 : f32
      %19 = vector.broadcast %cst_16 : f32 to vector<256x128xf32>
      %20 = arith.maximumf %18, %19 : vector<256x128xf32>
      %c0_17 = arith.constant 0 : index
      %c0_18 = arith.constant 0 : index
      %21 = vector.load %arg7[%c0_17, %c0_18] : memref<256x128xf32, #tpu.memory_space<vmem>>, vector<256x128xf32>
      tpu.vector_store %arg7[%c0_17, %c0_18], %20 {strides = array<i32>} : memref<256x128xf32, #tpu.memory_space<vmem>>, vector<256x128xf32>,
    } else {
    }
    return
  }
  func.func @transform_0(%arg0: i32, %arg1: i32, %arg2: i32) -> (i32, i32) {
    %c0_i32 = arith.constant 0 : i32
    return %arg0, %arg2 : i32, i32
  }
  func.func @transform_1(%arg0: i32, %arg1: i32, %arg2: i32) -> (i32, i32) {
    %c0_i32 = arith.constant 0 : i32
    return %arg2, %arg1 : i32, i32
  }
  func.func @transform_2(%arg0: i32, %arg1: i32, %arg2: i32) -> (i32, i32) {
    %c0_i32 = arith.constant 0 : i32
    %c0_i32_0 = arith.constant 0 : i32
    return %c0_i32, %arg1 : i32, i32
  }
  func.func @transform_3(%arg0: i32, %arg1: i32, %arg2: i32) -> (i32, i32) {
    %c0_i32 = arith.constant 0 : i32
    return %arg0, %arg1 : i32, i32
  }
  func.func @transform_4(%arg0: i32, %arg1: i32, %arg2: i32) -> (i32, i32) {
    %c0_i32 = arith.constant 0 : i32
    return %arg0, %arg1 : i32, i32
  }
}

</mosaic_0001>

<bundles_post_ra>
// kernel: _lambda_.4
= control target key start
LH: loop header
LB: loop body
LE: loop exit
PB: predicated region body
PF: predicated region fallthrough
CT: control target
= control target key end

     0   :  { %s1467_s12 = smov 0   ;;  %s1469_s13 = smov 0   ;;  %s1604_s0 = inlined_call_operand.vmem [shape: bf16[512,128], index: 0, kind: input, shape index: {}]   ;;  %s1605_s1 = inlined_call_operand.vmem [shape: bf16[128,128], index: 1, kind: input, shape index: {}]   ;;  %s1606_s2 = inlined_call_operand.vmem [shape: f32[1,128], index: 2, kind: input, shape index: {}]   ;;  %s1607_s3 = inlined_call_operand.vmem [shape: bf16[512,128], index: 3, kind: output, shape index: {}]  }
   0x1   :  { %s1471_s14 = smov 0  }
   0x2 LB: > { %s32_s15 = sadd.s32 1, %s1441_s13  ;;  %p1096_p0 = scmp.ge.s32.totalorder %s1445_s14, 1  ;;  %s1445_s14 = sphi %s1471_s14, %s13_s14   ;;  %s1441_s13 = sphi %s1469_s13, %s1609_s13   ;;  %s1437_s12 = sphi %s1467_s12, %s1608_s12  }
   0x3   : > { %p34_p1 = scmp.ge.s32.totalorder %s32_s15, 2  ;;  %p188_p2 = scmp.lt.s32.totalorder %s1445_s14, 3 }
   0x5   : > { %s1611_s15 = smov (%p34_p1, %s32_s15), 0  ;;  %p189_p3 = pnand %p1096_p0, %p188_p2 }
   0x6   : > { %s1097_s18 = sshll.u32 (!%p189_p3), %s1437_s12, 5 }
   0x7   : > { %192 = sbr.rel (%p189_p3) target bundleno = 273 (0x111), region = 32  ;;  %p230_p4 = scmp.lt.s32.totalorder (!%p189_p3), %s1097_s18, 63 }
   0xc   : > { %v1399_v0 = vld [vmem:[%s1605_s1 + $0x38] sm:$0xff]   ;;  %v1400_v1 = vld [vmem:[%s1605_s1 + $0x30] sm:$0xff]   ;;  %s1613_s18 = smov (!%p230_p4, %s1097_s18), 63  ;;  %v1401_v2 = vld [vmem:[%s1605_s1 + $0x28] sm:$0xff]  }
   0xd   : > { %1311 = vmatprep.subr.bf16.mxu0 %v1399_v0  ;;  %1359 = vmatprep.subr.bf16.mxu1 %v1399_v0  ;;  %s1098_s23 = sshll.u32 %s1613_s18, 2  ;;  %v1402_v3 = vld [vmem:[%s1605_s1 + $0x20] sm:$0xff]   ;;  %v1403_v6 = vld [vmem:[%s1605_s1 + $0x18] sm:$0xff]   ;;  %v1404_v7 = vld [vmem:[%s1605_s1 + $0x10] sm:$0xff]  }
   0xe   : > { %1312 = vmatpush3.bf16.msra.mxu0 %v1399_v0  ;;  %1367 = vmatpush3.bf16.msra.mxu1 %v1399_v0  ;;  %s1502_s26 = scalar_lea.vmem %s1604_s0, %s1098_s23  ;;  %v1405_v8 = vld [vmem:[%s1605_s1 + $0x8] sm:$0xff]   ;;  %v1406_v9 = vld [vmem:[%s1605_s1] sm:$0xff]   ;;  %s1551_s17 = scalar_lea.vmem %s1607_s3, %s1098_s23 }
   0xf   : > { %1313 = vmatprep.subr.bf16.mxu0 %v1400_v1  ;;  %1360 = vmatprep.subr.bf16.mxu1 %v1400_v1  ;;  %v1407_v4 = vld [vmem:[%s1502_s26] sm:$0xff]   ;;  %v1409_v10 = vld [vmem:[%s1502_s26 + $0x8] sm:$0xff]   ;;  %v1411_v12 = vld [vmem:[%s1502_s26 + $0x10] sm:$0xff]  }
  0x10   : > { %v1408_v5 = vld [vmem:[%s1502_s26 + $0x40] sm:$0xff]   ;;  %1327 = vmatprep.mubr.bf16.mxu0 %v1407_v4  ;;  %v1410_v11 = vld [vmem:[%s1502_s26 + $0x48] sm:$0xff]   ;;  %v1412_v13 = vld [vmem:[%s1502_s26 + $0x50] sm:$0xff]  }
  0x11   : > { %1343 = vmatprep.mubr.bf16.mxu1 %v1408_v5  ;;  %v1413_v14 = vld [vmem:[%s1502_s26 + $0x18] sm:$0xff]   ;;  %v1415_v16 = vld [vmem:[%s1502_s26 + $0x20] sm:$0xff]   ;;  %v1417_v18 = vld [vmem:[%s1502_s26 + $0x28] sm:$0xff]  }
  0x12   : > { %1314 = vmatpush3.bf16.msra.mxu0 %v1400_v1  ;;  %1368 = vmatpush3.bf16.msra.mxu1 %v1400_v1  ;;  %v1414_v15 = vld [vmem:[%s1502_s26 + $0x58] sm:$0xff]   ;;  %v1416_v17 = vld [vmem:[%s1502_s26 + $0x60] sm:$0xff]   ;;  %v1418_v19 = vld [vmem:[%s1502_s26 + $0x68] sm:$0xff]  }
  0x13   : > { %1315 = vmatprep.subr.bf16.mxu0 %v1401_v2  ;;  %1361 = vmatprep.subr.bf16.mxu1 %v1401_v2  ;;  %v1419_v20 = vld [vmem:[%s1502_s26 + $0x30] sm:$0xff]   ;;  %v1421_v22 = vld [vmem:[%s1502_s26 + $0x38] sm:$0xff]   ;;  %v1538_v26 = vld [vmem:[%s1606_s2] ss:$0 sm:$0xff] }
  0x14   : > { %v1420_v21 = vld [vmem:[%s1502_s26 + $0x70] sm:$0xff]   ;;  %v1422_v23 = vld [vmem:[%s1502_s26 + $0x78] sm:$0xff]  }
  0x16   : > { %1316 = vmatpush3.bf16.msra.mxu0 %v1401_v2  ;;  %1369 = vmatpush3.bf16.msra.mxu1 %v1401_v2 }
  0x17   : > { %1317 = vmatprep.subr.bf16.mxu0 %v1402_v3  ;;  %1362 = vmatprep.subr.bf16.mxu1 %v1402_v3 }
  0x1a   : > { %1318 = vmatpush3.bf16.msra.mxu0 %v1402_v3  ;;  %1370 = vmatpush3.bf16.msra.mxu1 %v1402_v3 }
  0x1b   : > { %1319 = vmatprep.subr.bf16.mxu0 %v1403_v6  ;;  %1363 = vmatprep.subr.bf16.mxu1 %v1403_v6 }
  0x1e   : > { %1320 = vmatpush3.bf16.msra.mxu0 %v1403_v6  ;;  %1371 = vmatpush3.bf16.msra.mxu1 %v1403_v6 }
  0x1f   : > { %1321 = vmatprep.subr.bf16.mxu0 %v1404_v7  ;;  %1364 = vmatprep.subr.bf16.mxu1 %v1404_v7 }
  0x22   : > { %1322 = vmatpush3.bf16.msra.mxu0 %v1404_v7  ;;  %1372 = vmatpush3.bf16.msra.mxu1 %v1404_v7 }
  0x23   : > { %1323 = vmatprep.subr.bf16.mxu0 %v1405_v8  ;;  %1365 = vmatprep.subr.bf16.mxu1 %v1405_v8 }
  0x26   : > { %1324 = vmatpush3.bf16.msra.mxu0 %v1405_v8  ;;  %1373 = vmatpush3.bf16.msra.mxu1 %v1405_v8 }
  0x27   : > { %1325 = vmatprep.subr.bf16.mxu0 %v1406_v9  ;;  %1366 = vmatprep.subr.bf16.mxu1 %v1406_v9 }
  0x2a   : > { %1326 = vmatpush3.bf16.msra.mxu0 %v1406_v9  ;;  %1374 = vmatpush3.bf16.msra.mxu1 %v1406_v9 }
  0x2d   : > { %1328 = vmatmul.mubr.bf16.vlgmr.msra.gmra.mxu0 %v1409_v10  ;;  %1344 = vmatmul.mubr.bf16.vlgmr.msra.gmra.mxu1 %v1410_v11 }
  0x2e   : > { %1331 = vmatprep.mubr.bf16.mxu0 %v1411_v12  ;;  %1347 = vmatprep.mubr.bf16.mxu1 %v1412_v13 }
  0x35   : > { %1332 = vmatmul.mubr.bf16.gmra.mxu0 %v1413_v14  ;;  %1348 = vmatmul.mubr.bf16.gmra.mxu1 %v1414_v15 }
  0x36   : > { %1335 = vmatprep.mubr.bf16.mxu0 %v1415_v16  ;;  %1351 = vmatprep.mubr.bf16.mxu1 %v1416_v17 }
  0x3d   : > { %1336 = vmatmul.mubr.bf16.gmra.mxu0 %v1417_v18  ;;  %1352 = vmatmul.mubr.bf16.gmra.mxu1 %v1418_v19 }
  0x3e   : > { %1339 = vmatprep.mubr.bf16.mxu0 %v1419_v20  ;;  %1355 = vmatprep.mubr.bf16.mxu1 %v1420_v21 }
  0x45   : > { %1340 = vmatmul.mubr.bf16.gmra.mxu0 %v1421_v22  ;;  %1356 = vmatmul.mubr.bf16.gmra.mxu1 %v1422_v23 }
  0xed   : > { %v1329_v24 = vpop.f32.mrf.mxu0  ;;  %v1345_v25 = vpop.f32.mrf.mxu1 }
  0xee   : > { %v789_v31 = vadd.f32 %v1329_v24, %v1538_v26  ;;  %v805_v32 = vadd.f32 %v1345_v25, %v1538_v26 }
  0xef   : > { %v554_v27 = vpop.f32.mrf.mxu0  ;;  %v618_v28 = vpop.f32.mrf.mxu1 }
  0xf0   : > { %v787_v35 = vadd.f32 %v1538_v26, %v554_v27  ;;  %v803_v36 = vadd.f32 %v1538_v26, %v618_v28 }
  0xf1   : > { %v1330_v29 = vpop.f32.mrf.mxu0  ;;  %v1346_v30 = vpop.f32.mrf.mxu1 }
  0xf2   : > { %v790_v33 = vadd.f32 %v1330_v29, %v1538_v26  ;;  %v806_v34 = vadd.f32 %v1346_v30, %v1538_v26 }
  0xf3   : > { %v557_v37 = vpop.f32.mrf.mxu0  ;;  %v621_v38 = vpop.f32.mrf.mxu1 }
  0xf4   : > { %v1200_v39 = vpack.c.bf16 %v790_v33, %v789_v31  ;;  %v1240_v40 = vpack.c.bf16 %v806_v34, %v805_v32  ;;  %v788_v41 = vadd.f32 %v1538_v26, %v557_v37  ;;  %v804_v42 = vadd.f32 %v1538_v26, %v621_v38 }
  0xf5   : > { %v1333_v43 = vpop.f32.mrf.mxu0  ;;  %v1349_v44 = vpop.f32.mrf.mxu1 }
  0xf6   : > { %1272 = vst [vmem:[%s1551_s17 + $0x8] sm:$0xff] %v1200_v39   ;;  %1280 = vst [vmem:[%s1551_s17 + $0x48] sm:$0xff] %v1240_v40   ;;  %v1195_v45 = vpack.c.bf16 %v788_v41, %v787_v35  ;;  %v1235_v46 = vpack.c.bf16 %v804_v42, %v803_v36  ;;  %v793_v51 = vadd.f32 %v1333_v43, %v1538_v26 }
  0xf7   : > { %v570_v47 = vpop.f32.mrf.mxu0  ;;  %v634_v48 = vpop.f32.mrf.mxu1  ;;  %v809_v52 = vadd.f32 %v1349_v44, %v1538_v26 }
  0xf8   : > { %1196 = vst [vmem:[%s1551_s17] sm:$0xff] %v1195_v45   ;;  %1279 = vst [vmem:[%s1551_s17 + $0x40] sm:$0xff] %v1235_v46   ;;  %v791_v55 = vadd.f32 %v1538_v26, %v570_v47  ;;  %v807_v56 = vadd.f32 %v1538_v26, %v634_v48 }
  0xf9   : > { %v1334_v49 = vpop.f32.mrf.mxu0  ;;  %v1350_v50 = vpop.f32.mrf.mxu1 }
  0xfa   : > { %v794_v53 = vadd.f32 %v1334_v49, %v1538_v26  ;;  %v810_v54 = vadd.f32 %v1350_v50, %v1538_v26 }
  0xfb   : > { %v573_v57 = vpop.f32.mrf.mxu0  ;;  %v637_v58 = vpop.f32.mrf.mxu1 }
  0xfc   : > { %v1210_v59 = vpack.c.bf16 %v794_v53, %v793_v51  ;;  %v1250_v60 = vpack.c.bf16 %v810_v54, %v809_v52  ;;  %v792_v61 = vadd.f32 %v1538_v26, %v573_v57  ;;  %v808_v62 = vadd.f32 %v1538_v26, %v637_v58 }
  0xfd   : > { %v1337_v63 = vpop.f32.mrf.mxu0  ;;  %v1353_v0 = vpop.f32.mrf.mxu1 }
  0xfe   : > { %1274 = vst [vmem:[%s1551_s17 + $0x18] sm:$0xff] %v1210_v59   ;;  %1282 = vst [vmem:[%s1551_s17 + $0x58] sm:$0xff] %v1250_v60   ;;  %v1205_v1 = vpack.c.bf16 %v792_v61, %v791_v55  ;;  %v1245_v2 = vpack.c.bf16 %v808_v62, %v807_v56  ;;  %v797_v7 = vadd.f32 %v1337_v63, %v1538_v26 }
  0xff   : > { %v586_v3 = vpop.f32.mrf.mxu0  ;;  %v650_v4 = vpop.f32.mrf.mxu1  ;;  %v813_v8 = vadd.f32 %v1353_v0, %v1538_v26 }
 0x100   : > { %1273 = vst [vmem:[%s1551_s17 + $0x10] sm:$0xff] %v1205_v1   ;;  %1281 = vst [vmem:[%s1551_s17 + $0x50] sm:$0xff] %v1245_v2   ;;  %v795_v11 = vadd.f32 %v1538_v26, %v586_v3  ;;  %v811_v12 = vadd.f32 %v1538_v26, %v650_v4 }
 0x101   : > { %v1338_v5 = vpop.f32.mrf.mxu0  ;;  %v1354_v6 = vpop.f32.mrf.mxu1 }
 0x102   : > { %v798_v9 = vadd.f32 %v1338_v5, %v1538_v26  ;;  %v814_v10 = vadd.f32 %v1354_v6, %v1538_v26 }
 0x103   : > { %v589_v13 = vpop.f32.mrf.mxu0  ;;  %v653_v14 = vpop.f32.mrf.mxu1 }
 0x104   : > { %v1220_v15 = vpack.c.bf16 %v798_v9, %v797_v7  ;;  %v1260_v16 = vpack.c.bf16 %v814_v10, %v813_v8  ;;  %v796_v17 = vadd.f32 %v1538_v26, %v589_v13  ;;  %v812_v18 = vadd.f32 %v1538_v26, %v653_v14 }
 0x105   : > { %v1341_v19 = vpop.f32.mrf.mxu0  ;;  %v1357_v20 = vpop.f32.mrf.mxu1 }
 0x106   : > { %1276 = vst [vmem:[%s1551_s17 + $0x28] sm:$0xff] %v1220_v15   ;;  %1284 = vst [vmem:[%s1551_s17 + $0x68] sm:$0xff] %v1260_v16   ;;  %v1215_v21 = vpack.c.bf16 %v796_v17, %v795_v11  ;;  %v1255_v22 = vpack.c.bf16 %v812_v18, %v811_v12  ;;  %v801_v28 = vadd.f32 %v1341_v19, %v1538_v26 }
 0x107   : > { %v602_v23 = vpop.f32.mrf.mxu0  ;;  %v666_v24 = vpop.f32.mrf.mxu1  ;;  %v817_v29 = vadd.f32 %v1357_v20, %v1538_v26 }
 0x108   : > { %1275 = vst [vmem:[%s1551_s17 + $0x20] sm:$0xff] %v1215_v21   ;;  %1283 = vst [vmem:[%s1551_s17 + $0x60] sm:$0xff] %v1255_v22   ;;  %v799_v32 = vadd.f32 %v1538_v26, %v602_v23  ;;  %v815_v33 = vadd.f32 %v1538_v26, %v666_v24 }
 0x109   : > { %v1342_v25 = vpop.f32.mrf.mxu0  ;;  %v1358_v27 = vpop.f32.mrf.mxu1 }
 0x10a   : > { %v802_v30 = vadd.f32 %v1342_v25, %v1538_v26  ;;  %v818_v31 = vadd.f32 %v1358_v27, %v1538_v26 }
 0x10b   : > { %v605_v34 = vpop.f32.mrf.mxu0  ;;  %v669_v35 = vpop.f32.mrf.mxu1 }
 0x10c   : > { %v1230_v36 = vpack.c.bf16 %v802_v30, %v801_v28  ;;  %v1270_v37 = vpack.c.bf16 %v818_v31, %v817_v29  ;;  %v800_v38 = vadd.f32 %v1538_v26, %v605_v34  ;;  %v816_v39 = vadd.f32 %v1538_v26, %v669_v35 }
 0x10e   : > { %1278 = vst [vmem:[%s1551_s17 + $0x38] sm:$0xff] %v1230_v36   ;;  %1286 = vst [vmem:[%s1551_s17 + $0x78] sm:$0xff] %v1270_v37   ;;  %v1225_v40 = vpack.c.bf16 %v800_v38, %v799_v32  ;;  %v1265_v41 = vpack.c.bf16 %v816_v39, %v815_v33 }
 0x110   : > { %1277 = vst [vmem:[%s1551_s17 + $0x30] sm:$0xff] %v1225_v40   ;;  %1285 = vst [vmem:[%s1551_s17 + $0x70] sm:$0xff] %v1265_v41  }
 0x111 PF: > { %s13_s14 = sadd.s32 1, %s1445_s14   ;;  %s1608_s12 = smov %s1441_s13 }
 0x112   : > { %p10_p5 = scmp.ge.s32.totalorder %s13_s14, 4   ;;  %s1609_s13 = smov %s1611_s15 }
 0x114   :  { %12 = sbr.rel (!%p10_p5) target bundleno = 2 (0x2), region = 76 }

// kernel: _lambda_.5
= control target key start
LH: loop header
LB: loop body
LE: loop exit
PB: predicated region body
PF: predicated region fallthrough
CT: control target
= control target key end

     0   :  { %s1499_s12 = smov 0   ;;  %s1501_s13 = smov 0   ;;  %s1636_s0 = inlined_call_operand.vmem [shape: bf16[512,128], index: 0, kind: input, shape index: {}]   ;;  %s1637_s1 = inlined_call_operand.vmem [shape: bf16[128,128], index: 1, kind: input, shape index: {}]   ;;  %s1638_s2 = inlined_call_operand.vmem [shape: f32[1,128], index: 2, kind: input, shape index: {}]   ;;  %s1639_s3 = inlined_call_operand.vmem [shape: bf16[512,128], index: 3, kind: output, shape index: {}]  }
   0x1   :  { %s1503_s14 = smov 0  }
   0x2 LB: > { %s32_s15 = sadd.s32 1, %s1473_s13  ;;  %p1128_p0 = scmp.ge.s32.totalorder %s1477_s14, 1  ;;  %s1477_s14 = sphi %s1503_s14, %s13_s14   ;;  %s1473_s13 = sphi %s1501_s13, %s1641_s13   ;;  %s1469_s12 = sphi %s1499_s12, %s1640_s12  }
   0x3   : > { %p34_p1 = scmp.ge.s32.totalorder %s32_s15, 2  ;;  %p188_p2 = scmp.lt.s32.totalorder %s1477_s14, 3 }
   0x5   : > { %s1643_s15 = smov (%p34_p1, %s32_s15), 0  ;;  %p189_p3 = pnand %p1128_p0, %p188_p2 }
   0x6   : > { %s1129_s18 = sshll.u32 (!%p189_p3), %s1469_s12, 5 }
   0x7   : > { %192 = sbr.rel (%p189_p3) target bundleno = 275 (0x113), region = 32  ;;  %p230_p4 = scmp.lt.s32.totalorder (!%p189_p3), %s1129_s18, 63 }
   0xc   : > { %v1431_v0 = vld [vmem:[%s1637_s1 + $0x38] sm:$0xff]   ;;  %v1432_v1 = vld [vmem:[%s1637_s1 + $0x30] sm:$0xff]   ;;  %s1645_s18 = smov (!%p230_p4, %s1129_s18), 63  ;;  %v1433_v2 = vld [vmem:[%s1637_s1 + $0x28] sm:$0xff]  }
   0xd   : > { %1343 = vmatprep.subr.bf16.mxu0 %v1431_v0  ;;  %1391 = vmatprep.subr.bf16.mxu1 %v1431_v0  ;;  %s1130_s23 = sshll.u32 %s1645_s18, 2  ;;  %v1434_v3 = vld [vmem:[%s1637_s1 + $0x20] sm:$0xff]   ;;  %v1435_v6 = vld [vmem:[%s1637_s1 + $0x18] sm:$0xff]   ;;  %v1436_v7 = vld [vmem:[%s1637_s1 + $0x10] sm:$0xff]  }
   0xe   : > { %1344 = vmatpush3.bf16.msra.mxu0 %v1431_v0  ;;  %1399 = vmatpush3.bf16.msra.mxu1 %v1431_v0  ;;  %s1534_s26 = scalar_lea.vmem %s1636_s0, %s1130_s23  ;;  %v1437_v8 = vld [vmem:[%s1637_s1 + $0x8] sm:$0xff]   ;;  %v1438_v9 = vld [vmem:[%s1637_s1] sm:$0xff]   ;;  %s1585_s17 = scalar_lea.vmem %s1639_s3, %s1130_s23 }
   0xf   : > { %1345 = vmatprep.subr.bf16.mxu0 %v1432_v1  ;;  %1392 = vmatprep.subr.bf16.mxu1 %v1432_v1  ;;  %v1439_v4 = vld [vmem:[%s1534_s26] sm:$0xff]   ;;  %v1441_v10 = vld [vmem:[%s1534_s26 + $0x8] sm:$0xff]   ;;  %v1443_v12 = vld [vmem:[%s1534_s26 + $0x10] sm:$0xff]  }
  0x10   : > { %v1440_v5 = vld [vmem:[%s1534_s26 + $0x40] sm:$0xff]   ;;  %1359 = vmatprep.mubr.bf16.mxu0 %v1439_v4  ;;  %v1442_v11 = vld [vmem:[%s1534_s26 + $0x48] sm:$0xff]   ;;  %v1444_v13 = vld [vmem:[%s1534_s26 + $0x50] sm:$0xff]  }
  0x11   : > { %1375 = vmatprep.mubr.bf16.mxu1 %v1440_v5  ;;  %v1445_v14 = vld [vmem:[%s1534_s26 + $0x18] sm:$0xff]   ;;  %v1447_v16 = vld [vmem:[%s1534_s26 + $0x20] sm:$0xff]   ;;  %v1449_v18 = vld [vmem:[%s1534_s26 + $0x28] sm:$0xff]  }
  0x12   : > { %1346 = vmatpush3.bf16.msra.mxu0 %v1432_v1  ;;  %1400 = vmatpush3.bf16.msra.mxu1 %v1432_v1  ;;  %v1446_v15 = vld [vmem:[%s1534_s26 + $0x58] sm:$0xff]   ;;  %v1448_v17 = vld [vmem:[%s1534_s26 + $0x60] sm:$0xff]   ;;  %v1450_v19 = vld [vmem:[%s1534_s26 + $0x68] sm:$0xff]  }
  0x13   : > { %1347 = vmatprep.subr.bf16.mxu0 %v1433_v2  ;;  %1393 = vmatprep.subr.bf16.mxu1 %v1433_v2  ;;  %v1451_v20 = vld [vmem:[%s1534_s26 + $0x30] sm:$0xff]   ;;  %v1453_v22 = vld [vmem:[%s1534_s26 + $0x38] sm:$0xff]   ;;  %v1570_v24 = vld [vmem:[%s1638_s2] ss:$0 sm:$0xff] }
  0x14   : > { %v1452_v21 = vld [vmem:[%s1534_s26 + $0x70] sm:$0xff]   ;;  %v1454_v23 = vld [vmem:[%s1534_s26 + $0x78] sm:$0xff]  }
  0x16   : > { %1348 = vmatpush3.bf16.msra.mxu0 %v1433_v2  ;;  %1401 = vmatpush3.bf16.msra.mxu1 %v1433_v2 }
  0x17   : > { %1349 = vmatprep.subr.bf16.mxu0 %v1434_v3  ;;  %1394 = vmatprep.subr.bf16.mxu1 %v1434_v3 }
  0x1a   : > { %1350 = vmatpush3.bf16.msra.mxu0 %v1434_v3  ;;  %1402 = vmatpush3.bf16.msra.mxu1 %v1434_v3 }
  0x1b   : > { %1351 = vmatprep.subr.bf16.mxu0 %v1435_v6  ;;  %1395 = vmatprep.subr.bf16.mxu1 %v1435_v6 }
  0x1e   : > { %1352 = vmatpush3.bf16.msra.mxu0 %v1435_v6  ;;  %1403 = vmatpush3.bf16.msra.mxu1 %v1435_v6 }
  0x1f   : > { %1353 = vmatprep.subr.bf16.mxu0 %v1436_v7  ;;  %1396 = vmatprep.subr.bf16.mxu1 %v1436_v7 }
  0x22   : > { %1354 = vmatpush3.bf16.msra.mxu0 %v1436_v7  ;;  %1404 = vmatpush3.bf16.msra.mxu1 %v1436_v7 }
  0x23   : > { %1355 = vmatprep.subr.bf16.mxu0 %v1437_v8  ;;  %1397 = vmatprep.subr.bf16.mxu1 %v1437_v8 }
  0x26   : > { %1356 = vmatpush3.bf16.msra.mxu0 %v1437_v8  ;;  %1405 = vmatpush3.bf16.msra.mxu1 %v1437_v8 }
  0x27   : > { %1357 = vmatprep.subr.bf16.mxu0 %v1438_v9  ;;  %1398 = vmatprep.subr.bf16.mxu1 %v1438_v9 }
  0x2a   : > { %1358 = vmatpush3.bf16.msra.mxu0 %v1438_v9  ;;  %1406 = vmatpush3.bf16.msra.mxu1 %v1438_v9 }
  0x2d   : > { %1360 = vmatmul.mubr.bf16.vlgmr.msra.gmra.mxu0 %v1441_v10  ;;  %1376 = vmatmul.mubr.bf16.vlgmr.msra.gmra.mxu1 %v1442_v11 }
  0x2e   : > { %1363 = vmatprep.mubr.bf16.mxu0 %v1443_v12  ;;  %1379 = vmatprep.mubr.bf16.mxu1 %v1444_v13 }
  0x35   : > { %1364 = vmatmul.mubr.bf16.gmra.mxu0 %v1445_v14  ;;  %1380 = vmatmul.mubr.bf16.gmra.mxu1 %v1446_v15 }
  0x36   : > { %1367 = vmatprep.mubr.bf16.mxu0 %v1447_v16  ;;  %1383 = vmatprep.mubr.bf16.mxu1 %v1448_v17 }
  0x3d   : > { %1368 = vmatmul.mubr.bf16.gmra.mxu0 %v1449_v18  ;;  %1384 = vmatmul.mubr.bf16.gmra.mxu1 %v1450_v19 }
  0x3e   : > { %1371 = vmatprep.mubr.bf16.mxu0 %v1451_v20  ;;  %1387 = vmatprep.mubr.bf16.mxu1 %v1452_v21 }
  0x45   : > { %1372 = vmatmul.mubr.bf16.gmra.mxu0 %v1453_v22  ;;  %1388 = vmatmul.mubr.bf16.gmra.mxu1 %v1454_v23 }
  0xed   : > { %v1361_v25 = vpop.f32.mrf.mxu0  ;;  %v1377_v26 = vpop.f32.mrf.mxu1 }
  0xee   : > { %v789_v27 = vadd.f32 %v1361_v25, %v1570_v24  ;;  %v805_v28 = vadd.f32 %v1377_v26, %v1570_v24 }
  0xef   : > { %v554_v29 = vpop.f32.mrf.mxu0  ;;  %v618_v30 = vpop.f32.mrf.mxu1 }
  0xf0   : > { %v787_v31 = vadd.f32 %v1570_v24, %v554_v29  ;;  %v803_v32 = vadd.f32 %v1570_v24, %v618_v30  ;;  %v821_v37 = vmax.f32 %v789_v27, 0.0  ;;  %v837_v38 = vmax.f32 %v805_v28, 0.0 }
  0xf1   : > { %v1362_v33 = vpop.f32.mrf.mxu0  ;;  %v1378_v34 = vpop.f32.mrf.mxu1 }
  0xf2   : > { %v790_v35 = vadd.f32 %v1362_v33, %v1570_v24  ;;  %v806_v36 = vadd.f32 %v1378_v34, %v1570_v24  ;;  %v819_v45 = vmax.f32 %v787_v31, 0.0  ;;  %v835_v46 = vmax.f32 %v803_v32, 0.0 }
  0xf3   : > { %v557_v39 = vpop.f32.mrf.mxu0  ;;  %v621_v40 = vpop.f32.mrf.mxu1 }
  0xf4   : > { %v822_v41 = vmax.f32 %v790_v35, 0.0  ;;  %v838_v42 = vmax.f32 %v806_v36, 0.0  ;;  %v788_v43 = vadd.f32 %v1570_v24, %v557_v39  ;;  %v804_v44 = vadd.f32 %v1570_v24, %v621_v40 }
  0xf5   : > { %v1365_v47 = vpop.f32.mrf.mxu0  ;;  %v1381_v48 = vpop.f32.mrf.mxu1 }
  0xf6   : > { %v1232_v49 = vpack.c.bf16 %v822_v41, %v821_v37  ;;  %v1272_v50 = vpack.c.bf16 %v838_v42, %v837_v38  ;;  %v820_v51 = vmax.f32 %v788_v43, 0.0  ;;  %v836_v52 = vmax.f32 %v804_v44, 0.0 }
  0xf7   : > { %v793_v53 = vadd.f32 %v1365_v47, %v1570_v24  ;;  %v809_v54 = vadd.f32 %v1381_v48, %v1570_v24  ;;  %v570_v55 = vpop.f32.mrf.mxu0  ;;  %v634_v56 = vpop.f32.mrf.mxu1 }
  0xf8   : > { %1304 = vst [vmem:[%s1585_s17 + $0x8] sm:$0xff] %v1232_v49   ;;  %1312 = vst [vmem:[%s1585_s17 + $0x48] sm:$0xff] %v1272_v50   ;;  %v1227_v57 = vpack.c.bf16 %v820_v51, %v819_v45  ;;  %v1267_v58 = vpack.c.bf16 %v836_v52, %v835_v46  ;;  %v791_v59 = vadd.f32 %v1570_v24, %v570_v55 }
  0xf9   : > { %v807_v60 = vadd.f32 %v1570_v24, %v634_v56  ;;  %v1366_v61 = vpop.f32.mrf.mxu0  ;;  %v1382_v62 = vpop.f32.mrf.mxu1  ;;  %v825_v1 = vmax.f32 %v793_v53, 0.0  ;;  %v841_v2 = vmax.f32 %v809_v54, 0.0 }
  0xfa   : > { %1228 = vst [vmem:[%s1585_s17] sm:$0xff] %v1227_v57   ;;  %1311 = vst [vmem:[%s1585_s17 + $0x40] sm:$0xff] %v1267_v58   ;;  %v794_v63 = vadd.f32 %v1366_v61, %v1570_v24  ;;  %v810_v0 = vadd.f32 %v1382_v62, %v1570_v24  ;;  %v823_v9 = vmax.f32 %v791_v59, 0.0 }
  0xfb   : > { %v573_v3 = vpop.f32.mrf.mxu0  ;;  %v637_v4 = vpop.f32.mrf.mxu1  ;;  %v839_v10 = vmax.f32 %v807_v60, 0.0 }
  0xfc   : > { %v826_v5 = vmax.f32 %v794_v63, 0.0  ;;  %v842_v6 = vmax.f32 %v810_v0, 0.0  ;;  %v792_v7 = vadd.f32 %v1570_v24, %v573_v3  ;;  %v808_v8 = vadd.f32 %v1570_v24, %v637_v4 }
  0xfd   : > { %v1369_v11 = vpop.f32.mrf.mxu0  ;;  %v1385_v12 = vpop.f32.mrf.mxu1 }
  0xfe   : > { %v1242_v13 = vpack.c.bf16 %v826_v5, %v825_v1  ;;  %v1282_v14 = vpack.c.bf16 %v842_v6, %v841_v2  ;;  %v824_v15 = vmax.f32 %v792_v7, 0.0  ;;  %v840_v16 = vmax.f32 %v808_v8, 0.0 }
  0xff   : > { %v797_v17 = vadd.f32 %v1369_v11, %v1570_v24  ;;  %v813_v18 = vadd.f32 %v1385_v12, %v1570_v24  ;;  %v586_v19 = vpop.f32.mrf.mxu0  ;;  %v650_v20 = vpop.f32.mrf.mxu1 }
 0x100   : > { %1306 = vst [vmem:[%s1585_s17 + $0x18] sm:$0xff] %v1242_v13   ;;  %1314 = vst [vmem:[%s1585_s17 + $0x58] sm:$0xff] %v1282_v14   ;;  %v1237_v21 = vpack.c.bf16 %v824_v15, %v823_v9  ;;  %v1277_v22 = vpack.c.bf16 %v840_v16, %v839_v10  ;;  %v795_v23 = vadd.f32 %v1570_v24, %v586_v19 }
 0x101   : > { %v811_v25 = vadd.f32 %v1570_v24, %v650_v20  ;;  %v1370_v26 = vpop.f32.mrf.mxu0  ;;  %v1386_v27 = vpop.f32.mrf.mxu1  ;;  %v829_v30 = vmax.f32 %v797_v17, 0.0  ;;  %v845_v31 = vmax.f32 %v813_v18, 0.0 }
 0x102   : > { %1305 = vst [vmem:[%s1585_s17 + $0x10] sm:$0xff] %v1237_v21   ;;  %1313 = vst [vmem:[%s1585_s17 + $0x50] sm:$0xff] %v1277_v22   ;;  %v798_v28 = vadd.f32 %v1370_v26, %v1570_v24  ;;  %v814_v29 = vadd.f32 %v1386_v27, %v1570_v24  ;;  %v827_v38 = vmax.f32 %v795_v23, 0.0 }
 0x103   : > { %v589_v32 = vpop.f32.mrf.mxu0  ;;  %v653_v33 = vpop.f32.mrf.mxu1  ;;  %v843_v39 = vmax.f32 %v811_v25, 0.0 }
 0x104   : > { %v830_v34 = vmax.f32 %v798_v28, 0.0  ;;  %v846_v35 = vmax.f32 %v814_v29, 0.0  ;;  %v796_v36 = vadd.f32 %v1570_v24, %v589_v32  ;;  %v812_v37 = vadd.f32 %v1570_v24, %v653_v33 }
 0x105   : > { %v1373_v40 = vpop.f32.mrf.mxu0  ;;  %v1389_v41 = vpop.f32.mrf.mxu1 }
 0x106   : > { %v1252_v42 = vpack.c.bf16 %v830_v34, %v829_v30  ;;  %v1292_v43 = vpack.c.bf16 %v846_v35, %v845_v31  ;;  %v828_v44 = vmax.f32 %v796_v36, 0.0  ;;  %v844_v45 = vmax.f32 %v812_v37, 0.0 }
 0x107   : > { %v801_v46 = vadd.f32 %v1373_v40, %v1570_v24  ;;  %v817_v47 = vadd.f32 %v1389_v41, %v1570_v24  ;;  %v602_v48 = vpop.f32.mrf.mxu0  ;;  %v666_v49 = vpop.f32.mrf.mxu1 }
 0x108   : > { %1308 = vst [vmem:[%s1585_s17 + $0x28] sm:$0xff] %v1252_v42   ;;  %1316 = vst [vmem:[%s1585_s17 + $0x68] sm:$0xff] %v1292_v43   ;;  %v1247_v50 = vpack.c.bf16 %v828_v44, %v827_v38  ;;  %v1287_v51 = vpack.c.bf16 %v844_v45, %v843_v39  ;;  %v799_v52 = vadd.f32 %v1570_v24, %v602_v48 }
 0x109   : > { %v815_v53 = vadd.f32 %v1570_v24, %v666_v49  ;;  %v1374_v54 = vpop.f32.mrf.mxu0  ;;  %v1390_v55 = vpop.f32.mrf.mxu1  ;;  %v833_v58 = vmax.f32 %v801_v46, 0.0  ;;  %v849_v59 = vmax.f32 %v817_v47, 0.0 }
 0x10a   : > { %1307 = vst [vmem:[%s1585_s17 + $0x20] sm:$0xff] %v1247_v50   ;;  %1315 = vst [vmem:[%s1585_s17 + $0x60] sm:$0xff] %v1287_v51   ;;  %v802_v56 = vadd.f32 %v1374_v54, %v1570_v24  ;;  %v818_v57 = vadd.f32 %v1390_v55, %v1570_v24  ;;  %v831_v2 = vmax.f32 %v799_v52, 0.0 }
 0x10b   : > { %v605_v60 = vpop.f32.mrf.mxu0  ;;  %v669_v61 = vpop.f32.mrf.mxu1  ;;  %v847_v3 = vmax.f32 %v815_v53, 0.0 }
 0x10c   : > { %v834_v62 = vmax.f32 %v802_v56, 0.0  ;;  %v850_v63 = vmax.f32 %v818_v57, 0.0  ;;  %v800_v0 = vadd.f32 %v1570_v24, %v605_v60  ;;  %v816_v1 = vadd.f32 %v1570_v24, %v669_v61 }
 0x10e   : > { %v1262_v4 = vpack.c.bf16 %v834_v62, %v833_v58  ;;  %v1302_v5 = vpack.c.bf16 %v850_v63, %v849_v59  ;;  %v832_v6 = vmax.f32 %v800_v0, 0.0  ;;  %v848_v7 = vmax.f32 %v816_v1, 0.0 }
 0x110   : > { %1310 = vst [vmem:[%s1585_s17 + $0x38] sm:$0xff] %v1262_v4   ;;  %1318 = vst [vmem:[%s1585_s17 + $0x78] sm:$0xff] %v1302_v5   ;;  %v1257_v8 = vpack.c.bf16 %v832_v6, %v831_v2  ;;  %v1297_v9 = vpack.c.bf16 %v848_v7, %v847_v3 }
 0x112   : > { %1309 = vst [vmem:[%s1585_s17 + $0x30] sm:$0xff] %v1257_v8   ;;  %1317 = vst [vmem:[%s1585_s17 + $0x70] sm:$0xff] %v1297_v9  }
 0x113 PF: > { %s13_s14 = sadd.s32 1, %s1477_s14   ;;  %s1640_s12 = smov %s1473_s13 }
 0x114   : > { %p10_p5 = scmp.ge.s32.totalorder %s13_s14, 4   ;;  %s1641_s13 = smov %s1643_s15 }
 0x116   :  { %12 = sbr.rel (!%p10_p5) target bundleno = 2 (0x2), region = 76 }

// kernel: _lambda_.7
= control target key start
LH: loop header
LB: loop body
LE: loop exit
PB: predicated region body
PF: predicated region fallthrough
CT: control target
= control target key end

     0   :  { %s1469_s15 = smov 0   ;;  %s1471_s16 = smov 0   ;;  %s1692_s0 = inlined_call_operand.vmem [shape: bf16[512,128], index: 0, kind: input, shape index: {}]   ;;  %s1693_s1 = inlined_call_operand.vmem [shape: bf16[128,128], index: 1, kind: input, shape index: {}]   ;;  %s1694_s2 = inlined_call_operand.vmem [shape: f32[1,128], index: 2, kind: input, shape index: {}]   ;;  %s1695_s3 = inlined_call_operand.vmem [shape: bf16[512,128], index: 3, kind: input, shape index: {}]   ;;  %s1696_s4 = inlined_call_operand.vmem [shape: f32[512,128], index: 4, kind: output, shape index: {}]  }
   0x1   :  { %s1473_s17 = smov 0  }
   0x2 LB: > { %s33_s18 = sadd.s32 1, %s1438_s16  ;;  %p1171_p0 = scmp.ge.s32.totalorder %s1442_s17, 1  ;;  %s1442_s17 = sphi %s1473_s17, %s14_s17   ;;  %s1438_s16 = sphi %s1471_s16, %s1698_s16   ;;  %s1434_s15 = sphi %s1469_s15, %s1697_s15  }
   0x3   : > { %p35_p1 = scmp.ge.s32.totalorder %s33_s18, 2  ;;  %p229_p2 = scmp.lt.s32.totalorder %s1442_s17, 3 }
   0x5   : > { %s1700_s18 = smov (%p35_p1, %s33_s18), 0  ;;  %p230_p3 = pnand %p1171_p0, %p229_p2 }
   0x6   : > { %s1172_s21 = sshll.u32 (!%p230_p3), %s1434_s15, 5 }
   0x7   : > { %233 = sbr.rel (%p230_p3) target bundleno = 275 (0x113), region = 36  ;;  %p281_p4 = scmp.lt.s32.totalorder (!%p230_p3), %s1172_s21, 63 }
   0xc   : > { %v1396_v0 = vld [vmem:[%s1693_s1 + $0x38] sm:$0xff]   ;;  %v1397_v1 = vld [vmem:[%s1693_s1 + $0x30] sm:$0xff]   ;;  %s1702_s21 = smov (!%p281_p4, %s1172_s21), 63  ;;  %v1398_v2 = vld [vmem:[%s1693_s1 + $0x28] sm:$0xff]  }
   0xd   : > { %1308 = vmatprep.subr.bf16.mxu0 %v1396_v0  ;;  %1356 = vmatprep.subr.bf16.mxu1 %v1396_v0  ;;  %s1173_s26 = sshll.u32 %s1702_s21, 2  ;;  %v1399_v3 = vld [vmem:[%s1693_s1 + $0x20] sm:$0xff]   ;;  %v1400_v6 = vld [vmem:[%s1693_s1 + $0x18] sm:$0xff]   ;;  %v1401_v7 = vld [vmem:[%s1693_s1 + $0x10] sm:$0xff]   ;;  %s1177_s23 = sshll.u32 %s1702_s21, 3 }
   0xe   : > { %1309 = vmatpush3.bf16.msra.mxu0 %v1396_v0  ;;  %1364 = vmatpush3.bf16.msra.mxu1 %v1396_v0  ;;  %s1504_s29 = scalar_lea.vmem %s1692_s0, %s1173_s26  ;;  %v1402_v8 = vld [vmem:[%s1693_s1 + $0x8] sm:$0xff]   ;;  %v1403_v9 = vld [vmem:[%s1693_s1] sm:$0xff]   ;;  %s1542_s19 = scalar_lea.vmem %s1695_s3, %s1173_s26 }
   0xf   : > { %1310 = vmatprep.subr.bf16.mxu0 %v1397_v1  ;;  %1357 = vmatprep.subr.bf16.mxu1 %v1397_v1  ;;  %v1404_v4 = vld [vmem:[%s1504_s29] sm:$0xff]   ;;  %v1406_v10 = vld [vmem:[%s1504_s29 + $0x8] sm:$0xff]   ;;  %v1408_v12 = vld [vmem:[%s1504_s29 + $0x10] sm:$0xff]   ;;  %s1567_s25 = scalar_lea.vmem %s1696_s4, %s1177_s23 }
  0x10   : > { %v1405_v5 = vld [vmem:[%s1504_s29 + $0x40] sm:$0xff]   ;;  %1324 = vmatprep.mubr.bf16.mxu0 %v1404_v4  ;;  %v1407_v11 = vld [vmem:[%s1504_s29 + $0x48] sm:$0xff]   ;;  %v1409_v13 = vld [vmem:[%s1504_s29 + $0x50] sm:$0xff]  }
  0x11   : > { %1340 = vmatprep.mubr.bf16.mxu1 %v1405_v5  ;;  %v1410_v14 = vld [vmem:[%s1504_s29 + $0x18] sm:$0xff]   ;;  %v1412_v16 = vld [vmem:[%s1504_s29 + $0x20] sm:$0xff]   ;;  %v1414_v18 = vld [vmem:[%s1504_s29 + $0x28] sm:$0xff]  }
  0x12   : > { %1311 = vmatpush3.bf16.msra.mxu0 %v1397_v1  ;;  %1365 = vmatpush3.bf16.msra.mxu1 %v1397_v1  ;;  %v1411_v15 = vld [vmem:[%s1504_s29 + $0x58] sm:$0xff]   ;;  %v1413_v17 = vld [vmem:[%s1504_s29 + $0x60] sm:$0xff]   ;;  %v1415_v19 = vld [vmem:[%s1504_s29 + $0x68] sm:$0xff]  }
  0x13   : > { %1312 = vmatprep.subr.bf16.mxu0 %v1398_v2  ;;  %1358 = vmatprep.subr.bf16.mxu1 %v1398_v2  ;;  %v1416_v20 = vld [vmem:[%s1504_s29 + $0x30] sm:$0xff]   ;;  %v1418_v22 = vld [vmem:[%s1504_s29 + $0x38] sm:$0xff]   ;;  %v1269_v24 = vld [vmem:[%s1542_s19 + $0x8] sm:$0xff]  }
  0x14   : > { %v1417_v21 = vld [vmem:[%s1504_s29 + $0x70] sm:$0xff]   ;;  %v1419_v23 = vld [vmem:[%s1504_s29 + $0x78] sm:$0xff]   ;;  %v1277_v25 = vld [vmem:[%s1542_s19 + $0x48] sm:$0xff]   ;;  %v1211_v29 = vunpack.c.l.bf16 %v1269_v24  ;;  %v1212_v46 = vunpack.c.h.bf16 %v1269_v24 }
  0x15   : > { %v1549_v26 = vld [vmem:[%s1694_s2] ss:$0 sm:$0xff]  ;;  %v1243_v30 = vunpack.c.l.bf16 %v1277_v25  ;;  %v1559_v43 = vld [vmem:[%s1542_s19 + $0x18] sm:$0xff]   ;;  %v1244_v48 = vunpack.c.h.bf16 %v1277_v25  ;;  %v1570_v55 = vld [vmem:[%s1542_s19 + $0x10] sm:$0xff]  }
  0x16   : > { %1313 = vmatpush3.bf16.msra.mxu0 %v1398_v2  ;;  %1366 = vmatpush3.bf16.msra.mxu1 %v1398_v2  ;;  %v1206_v27 = vld [vmem:[%s1542_s19] sm:$0xff]   ;;  %v1562_v44 = vld [vmem:[%s1542_s19 + $0x58] sm:$0xff]   ;;  %v1573_v56 = vld [vmem:[%s1542_s19 + $0x50] sm:$0xff]   ;;  %v1219_v61 = vunpack.c.l.bf16 %v1559_v43 }
  0x17   : > { %1314 = vmatprep.subr.bf16.mxu0 %v1399_v3  ;;  %1359 = vmatprep.subr.bf16.mxu1 %v1399_v3  ;;  %v1276_v28 = vld [vmem:[%s1542_s19 + $0x40] sm:$0xff]   ;;  %v1207_v35 = vunpack.c.l.bf16 %v1206_v27  ;;  %v1208_v49 = vunpack.c.h.bf16 %v1206_v27  ;;  %v1251_v62 = vunpack.c.l.bf16 %v1562_v44  ;;  %v1595_v24 = vld [vmem:[%s1542_s19 + $0x68] sm:$0xff]  }
  0x18   : > { %v1239_v36 = vunpack.c.l.bf16 %v1276_v28  ;;  %v1240_v50 = vunpack.c.h.bf16 %v1276_v28 }
  0x1a   : > { %1315 = vmatpush3.bf16.msra.mxu0 %v1399_v3  ;;  %1367 = vmatpush3.bf16.msra.mxu1 %v1399_v3 }
  0x1b   : > { %1316 = vmatprep.subr.bf16.mxu0 %v1400_v6  ;;  %1360 = vmatprep.subr.bf16.mxu1 %v1400_v6 }
  0x1e   : > { %1317 = vmatpush3.bf16.msra.mxu0 %v1400_v6  ;;  %1368 = vmatpush3.bf16.msra.mxu1 %v1400_v6 }
  0x1f   : > { %1318 = vmatprep.subr.bf16.mxu0 %v1401_v7  ;;  %1361 = vmatprep.subr.bf16.mxu1 %v1401_v7 }
  0x22   : > { %1319 = vmatpush3.bf16.msra.mxu0 %v1401_v7  ;;  %1369 = vmatpush3.bf16.msra.mxu1 %v1401_v7  ;;  %v1215_v7 = vunpack.c.l.bf16 %v1570_v55 }
  0x23   : > { %1320 = vmatprep.subr.bf16.mxu0 %v1402_v8  ;;  %1362 = vmatprep.subr.bf16.mxu1 %v1402_v8 }
  0x26   : > { %1321 = vmatpush3.bf16.msra.mxu0 %v1402_v8  ;;  %1370 = vmatpush3.bf16.msra.mxu1 %v1402_v8  ;;  %v1247_v8 = vunpack.c.l.bf16 %v1573_v56 }
  0x27   : > { %1322 = vmatprep.subr.bf16.mxu0 %v1403_v9  ;;  %1363 = vmatprep.subr.bf16.mxu1 %v1403_v9 }
  0x2a   : > { %1323 = vmatpush3.bf16.msra.mxu0 %v1403_v9  ;;  %1371 = vmatpush3.bf16.msra.mxu1 %v1403_v9 }
  0x2d   : > { %1325 = vmatmul.mubr.bf16.vlgmr.msra.gmra.mxu0 %v1406_v10  ;;  %1341 = vmatmul.mubr.bf16.vlgmr.msra.gmra.mxu1 %v1407_v11 }
  0x2e   : > { %1328 = vmatprep.mubr.bf16.mxu0 %v1408_v12  ;;  %1344 = vmatprep.mubr.bf16.mxu1 %v1409_v13 }
  0x35   : > { %1329 = vmatmul.mubr.bf16.gmra.mxu0 %v1410_v14  ;;  %1345 = vmatmul.mubr.bf16.gmra.mxu1 %v1411_v15 }
  0x36   : > { %1332 = vmatprep.mubr.bf16.mxu0 %v1412_v16  ;;  %1348 = vmatprep.mubr.bf16.mxu1 %v1413_v17  ;;  %v1220_v17 = vunpack.c.h.bf16 %v1559_v43  ;;  %v1259_v43 = vunpack.c.l.bf16 %v1595_v24 }
  0x3d   : > { %1333 = vmatmul.mubr.bf16.gmra.mxu0 %v1414_v18  ;;  %1349 = vmatmul.mubr.bf16.gmra.mxu1 %v1415_v19  ;;  %v1252_v18 = vunpack.c.h.bf16 %v1562_v44 }
  0x3e   : > { %1336 = vmatprep.mubr.bf16.mxu0 %v1416_v20  ;;  %1352 = vmatprep.mubr.bf16.mxu1 %v1417_v21 }
  0x45   : > { %1337 = vmatmul.mubr.bf16.gmra.mxu0 %v1418_v22  ;;  %1353 = vmatmul.mubr.bf16.gmra.mxu1 %v1419_v23  ;;  %v1592_v23 = vld [vmem:[%s1542_s19 + $0x28] sm:$0xff]  }
  0xed   : > { %v1326_v31 = vpop.f32.mrf.mxu0  ;;  %v1342_v32 = vpop.f32.mrf.mxu1 }
  0xee   : > { %v849_v33 = vadd.f32 %v1326_v31, %v1549_v26  ;;  %v865_v34 = vadd.f32 %v1342_v32, %v1549_v26  ;;  %v1248_v31 = vunpack.c.h.bf16 %v1573_v56 }
  0xef   : > { %v614_v37 = vpop.f32.mrf.mxu0  ;;  %v678_v38 = vpop.f32.mrf.mxu1 }
  0xf0   : > { %v945_v39 = vadd.f32 %v1211_v29, %v849_v33  ;;  %v961_v40 = vadd.f32 %v1243_v30, %v865_v34  ;;  %v847_v41 = vadd.f32 %v1549_v26, %v614_v37  ;;  %v863_v42 = vadd.f32 %v1549_v26, %v678_v38  ;;  %v1611_v37 = vld [vmem:[%s1542_s19 + $0x60] sm:$0xff]  }
  0xf1   : > { %v1327_v45 = vpop.f32.mrf.mxu0  ;;  %v1343_v47 = vpop.f32.mrf.mxu1  ;;  %v1216_v30 = vunpack.c.h.bf16 %v1570_v55 }
  0xf2   : > { %v977_v51 = vmax.f32 %v945_v39, 0.0  ;;  %v993_v52 = vmax.f32 %v961_v40, 0.0  ;;  %v943_v53 = vadd.f32 %v1207_v35, %v847_v41  ;;  %v959_v54 = vadd.f32 %v1239_v36, %v863_v42  ;;  %v1608_v36 = vld [vmem:[%s1542_s19 + $0x20] sm:$0xff]  }
  0xf3   : > { %v850_v57 = vadd.f32 %v1327_v45, %v1549_v26  ;;  %v866_v58 = vadd.f32 %v1343_v47, %v1549_v26  ;;  %v617_v59 = vpop.f32.mrf.mxu0  ;;  %v681_v60 = vpop.f32.mrf.mxu1  ;;  %v1227_v42 = vunpack.c.l.bf16 %v1592_v23 }
  0xf4   : > { %1009 = vst [vmem:[%s1567_s25 + $0x10] sm:$0xff] %v977_v51  ;;  %1025 = vst [vmem:[%s1567_s25 + $0x90] sm:$0xff] %v993_v52  ;;  %v975_v63 = vmax.f32 %v943_v53, 0.0  ;;  %v991_v0 = vmax.f32 %v959_v54, 0.0  ;;  %v848_v1 = vadd.f32 %v1549_v26, %v617_v59  ;;  %v864_v2 = vadd.f32 %v1549_v26, %v681_v60 }
  0xf5   : > { %v946_v3 = vadd.f32 %v1212_v46, %v850_v57  ;;  %v962_v4 = vadd.f32 %v1244_v48, %v866_v58  ;;  %v1330_v5 = vpop.f32.mrf.mxu0  ;;  %v1346_v6 = vpop.f32.mrf.mxu1  ;;  %v1223_v52 = vunpack.c.l.bf16 %v1608_v36  ;;  %v1255_v53 = vunpack.c.l.bf16 %v1611_v37 }
  0xf6   : > { %1007 = vst [vmem:[%s1567_s25] sm:$0xff] %v975_v63  ;;  %1023 = vst [vmem:[%s1567_s25 + $0x80] sm:$0xff] %v991_v0  ;;  %v944_v9 = vadd.f32 %v1208_v49, %v848_v1  ;;  %v960_v10 = vadd.f32 %v1240_v50, %v864_v2  ;;  %v853_v11 = vadd.f32 %v1330_v5, %v1549_v26  ;;  %v1260_v63 = vunpack.c.h.bf16 %v1595_v24  ;;  %v1635_v5 = vld [vmem:[%s1542_s19 + $0x78] sm:$0xff]  }
  0xf7   : > { %v869_v12 = vadd.f32 %v1346_v6, %v1549_v26  ;;  %v978_v13 = vmax.f32 %v946_v3, 0.0  ;;  %v994_v14 = vmax.f32 %v962_v4, 0.0  ;;  %v630_v15 = vpop.f32.mrf.mxu0  ;;  %v694_v16 = vpop.f32.mrf.mxu1  ;;  %v1632_v4 = vld [vmem:[%s1542_s19 + $0x38] sm:$0xff]  }
  0xf8   : > { %v976_v19 = vmax.f32 %v944_v9, 0.0  ;;  %v992_v20 = vmax.f32 %v960_v10, 0.0  ;;  %v949_v21 = vadd.f32 %v1219_v61, %v853_v11  ;;  %v851_v25 = vadd.f32 %v1549_v26, %v630_v15 }
  0xf9   : > { %v965_v22 = vadd.f32 %v1251_v62, %v869_v12  ;;  %1010 = vst [vmem:[%s1567_s25 + $0x18] sm:$0xff] %v978_v13  ;;  %1026 = vst [vmem:[%s1567_s25 + $0x98] sm:$0xff] %v994_v14  ;;  %v867_v27 = vadd.f32 %v1549_v26, %v694_v16  ;;  %v1331_v28 = vpop.f32.mrf.mxu0  ;;  %v1347_v29 = vpop.f32.mrf.mxu1  ;;  %v1228_v62 = vunpack.c.h.bf16 %v1592_v23  ;;  %v1224_v10 = vunpack.c.h.bf16 %v1608_v36  ;;  %v1644_v16 = vld [vmem:[%s1542_s19 + $0x30] sm:$0xff]  }
  0xfa   : > { %1008 = vst [vmem:[%s1567_s25 + $0x8] sm:$0xff] %v976_v19  ;;  %1024 = vst [vmem:[%s1567_s25 + $0x88] sm:$0xff] %v992_v20  ;;  %v981_v32 = vmax.f32 %v949_v21, 0.0  ;;  %v854_v34 = vadd.f32 %v1331_v28, %v1549_v26  ;;  %v870_v35 = vadd.f32 %v1347_v29, %v1549_v26  ;;  %v947_v38 = vadd.f32 %v1215_v7, %v851_v25 }
  0xfb   : > { %v997_v33 = vmax.f32 %v965_v22, 0.0  ;;  %v963_v39 = vadd.f32 %v1247_v8, %v867_v27  ;;  %v633_v40 = vpop.f32.mrf.mxu0  ;;  %v697_v41 = vpop.f32.mrf.mxu1  ;;  %v1256_v11 = vunpack.c.h.bf16 %v1611_v37  ;;  %v1235_v22 = vunpack.c.l.bf16 %v1632_v4 }
  0xfc   : > { %1013 = vst [vmem:[%s1567_s25 + $0x30] sm:$0xff] %v981_v32  ;;  %v950_v44 = vadd.f32 %v1220_v17, %v854_v34  ;;  %v966_v45 = vadd.f32 %v1252_v18, %v870_v35  ;;  %v852_v46 = vadd.f32 %v1549_v26, %v633_v40  ;;  %v868_v47 = vadd.f32 %v1549_v26, %v697_v41  ;;  %v1647_v17 = vld [vmem:[%s1542_s19 + $0x70] sm:$0xff]  }
  0xfd   : > { %1029 = vst [vmem:[%s1567_s25 + $0xb0] sm:$0xff] %v997_v33  ;;  %v979_v48 = vmax.f32 %v947_v38, 0.0  ;;  %v995_v49 = vmax.f32 %v963_v39, 0.0  ;;  %v1334_v50 = vpop.f32.mrf.mxu0  ;;  %v1350_v51 = vpop.f32.mrf.mxu1  ;;  %v1267_v23 = vunpack.c.l.bf16 %v1635_v5  ;;  %v1231_v33 = vunpack.c.l.bf16 %v1644_v16 }
  0xfe   : > { %v982_v54 = vmax.f32 %v950_v44, 0.0  ;;  %v998_v55 = vmax.f32 %v966_v45, 0.0  ;;  %v948_v56 = vadd.f32 %v1216_v30, %v852_v46  ;;  %v964_v57 = vadd.f32 %v1248_v31, %v868_v47 }
  0xff   : > { %1011 = vst [vmem:[%s1567_s25 + $0x20] sm:$0xff] %v979_v48  ;;  %1027 = vst [vmem:[%s1567_s25 + $0xa0] sm:$0xff] %v995_v49  ;;  %v857_v58 = vadd.f32 %v1334_v50, %v1549_v26  ;;  %v873_v59 = vadd.f32 %v1350_v51, %v1549_v26  ;;  %v646_v60 = vpop.f32.mrf.mxu0  ;;  %v710_v61 = vpop.f32.mrf.mxu1  ;;  %v1263_v34 = vunpack.c.l.bf16 %v1647_v17  ;;  %v1268_v44 = vunpack.c.h.bf16 %v1635_v5 }
 0x100   : > { %1014 = vst [vmem:[%s1567_s25 + $0x38] sm:$0xff] %v982_v54  ;;  %1030 = vst [vmem:[%s1567_s25 + $0xb8] sm:$0xff] %v998_v55  ;;  %v980_v0 = vmax.f32 %v948_v56, 0.0  ;;  %v996_v1 = vmax.f32 %v964_v57, 0.0  ;;  %v855_v2 = vadd.f32 %v1549_v26, %v646_v60  ;;  %v871_v3 = vadd.f32 %v1549_v26, %v710_v61 }
 0x101   : > { %v953_v6 = vadd.f32 %v1227_v42, %v857_v58  ;;  %v969_v7 = vadd.f32 %v1259_v43, %v873_v59  ;;  %v1335_v8 = vpop.f32.mrf.mxu0  ;;  %v1351_v9 = vpop.f32.mrf.mxu1  ;;  %v1236_v43 = vunpack.c.h.bf16 %v1632_v4  ;;  %v1264_v54 = vunpack.c.h.bf16 %v1647_v17 }
 0x102   : > { %1012 = vst [vmem:[%s1567_s25 + $0x28] sm:$0xff] %v980_v0  ;;  %1028 = vst [vmem:[%s1567_s25 + $0xa8] sm:$0xff] %v996_v1  ;;  %v951_v12 = vadd.f32 %v1223_v52, %v855_v2  ;;  %v967_v13 = vadd.f32 %v1255_v53, %v871_v3  ;;  %v858_v14 = vadd.f32 %v1335_v8, %v1549_v26  ;;  %v1232_v53 = vunpack.c.h.bf16 %v1644_v16 }
 0x103   : > { %v874_v15 = vadd.f32 %v1351_v9, %v1549_v26  ;;  %v985_v18 = vmax.f32 %v953_v6, 0.0  ;;  %v1001_v19 = vmax.f32 %v969_v7, 0.0  ;;  %v649_v20 = vpop.f32.mrf.mxu0  ;;  %v713_v21 = vpop.f32.mrf.mxu1 }
 0x104   : > { %v983_v24 = vmax.f32 %v951_v12, 0.0  ;;  %v999_v25 = vmax.f32 %v967_v13, 0.0  ;;  %v954_v27 = vadd.f32 %v1228_v62, %v858_v14  ;;  %v856_v29 = vadd.f32 %v1549_v26, %v649_v20 }
 0x105   : > { %v970_v28 = vadd.f32 %v1260_v63, %v874_v15  ;;  %1017 = vst [vmem:[%s1567_s25 + $0x50] sm:$0xff] %v985_v18  ;;  %1033 = vst [vmem:[%s1567_s25 + $0xd0] sm:$0xff] %v1001_v19  ;;  %v872_v30 = vadd.f32 %v1549_v26, %v713_v21  ;;  %v1338_v31 = vpop.f32.mrf.mxu0  ;;  %v1354_v32 = vpop.f32.mrf.mxu1 }
 0x106   : > { %1015 = vst [vmem:[%s1567_s25 + $0x40] sm:$0xff] %v983_v24  ;;  %1031 = vst [vmem:[%s1567_s25 + $0xc0] sm:$0xff] %v999_v25  ;;  %v986_v35 = vmax.f32 %v954_v27, 0.0  ;;  %v861_v37 = vadd.f32 %v1338_v31, %v1549_v26  ;;  %v877_v38 = vadd.f32 %v1354_v32, %v1549_v26  ;;  %v952_v39 = vadd.f32 %v1224_v10, %v856_v29 }
 0x107   : > { %v1002_v36 = vmax.f32 %v970_v28, 0.0  ;;  %v968_v40 = vadd.f32 %v1256_v11, %v872_v30  ;;  %v662_v41 = vpop.f32.mrf.mxu0  ;;  %v726_v42 = vpop.f32.mrf.mxu1 }
 0x108   : > { %1018 = vst [vmem:[%s1567_s25 + $0x58] sm:$0xff] %v986_v35  ;;  %v957_v45 = vadd.f32 %v1235_v22, %v861_v37  ;;  %v973_v46 = vadd.f32 %v1267_v23, %v877_v38  ;;  %v859_v47 = vadd.f32 %v1549_v26, %v662_v41  ;;  %v875_v48 = vadd.f32 %v1549_v26, %v726_v42 }
 0x109   : > { %1034 = vst [vmem:[%s1567_s25 + $0xd8] sm:$0xff] %v1002_v36  ;;  %v984_v49 = vmax.f32 %v952_v39, 0.0  ;;  %v1000_v50 = vmax.f32 %v968_v40, 0.0  ;;  %v1339_v51 = vpop.f32.mrf.mxu0  ;;  %v1355_v52 = vpop.f32.mrf.mxu1 }
 0x10a   : > { %v989_v55 = vmax.f32 %v957_v45, 0.0  ;;  %v1005_v56 = vmax.f32 %v973_v46, 0.0  ;;  %v955_v57 = vadd.f32 %v1231_v33, %v859_v47  ;;  %v971_v58 = vadd.f32 %v1263_v34, %v875_v48 }
 0x10b   : > { %1016 = vst [vmem:[%s1567_s25 + $0x48] sm:$0xff] %v984_v49  ;;  %1032 = vst [vmem:[%s1567_s25 + $0xc8] sm:$0xff] %v1000_v50  ;;  %v862_v59 = vadd.f32 %v1339_v51, %v1549_v26  ;;  %v878_v60 = vadd.f32 %v1355_v52, %v1549_v26  ;;  %v665_v61 = vpop.f32.mrf.mxu0  ;;  %v729_v62 = vpop.f32.mrf.mxu1 }
 0x10c   : > { %1021 = vst [vmem:[%s1567_s25 + $0x70] sm:$0xff] %v989_v55  ;;  %1037 = vst [vmem:[%s1567_s25 + $0xf0] sm:$0xff] %v1005_v56  ;;  %v987_v63 = vmax.f32 %v955_v57, 0.0  ;;  %v1003_v0 = vmax.f32 %v971_v58, 0.0  ;;  %v860_v1 = vadd.f32 %v1549_v26, %v665_v61  ;;  %v876_v2 = vadd.f32 %v1549_v26, %v729_v62 }
 0x10d   : > { %v958_v3 = vadd.f32 %v1236_v43, %v862_v59  ;;  %v974_v4 = vadd.f32 %v1268_v44, %v878_v60 }
 0x10e   : > { %1019 = vst [vmem:[%s1567_s25 + $0x60] sm:$0xff] %v987_v63  ;;  %1035 = vst [vmem:[%s1567_s25 + $0xe0] sm:$0xff] %v1003_v0  ;;  %v956_v5 = vadd.f32 %v1232_v53, %v860_v1  ;;  %v972_v6 = vadd.f32 %v1264_v54, %v876_v2 }
 0x10f   : > { %v990_v7 = vmax.f32 %v958_v3, 0.0  ;;  %v1006_v8 = vmax.f32 %v974_v4, 0.0 }
 0x110   : > { %v988_v9 = vmax.f32 %v956_v5, 0.0  ;;  %v1004_v10 = vmax.f32 %v972_v6, 0.0 }
 0x111   : > { %1022 = vst [vmem:[%s1567_s25 + $0x78] sm:$0xff] %v990_v7  ;;  %1038 = vst [vmem:[%s1567_s25 + $0xf8] sm:$0xff] %v1006_v8 }
 0x112   : > { %1020 = vst [vmem:[%s1567_s25 + $0x68] sm:$0xff] %v988_v9  ;;  %1036 = vst [vmem:[%s1567_s25 + $0xe8] sm:$0xff] %v1004_v10 }
 0x113 PF: > { %s14_s17 = sadd.s32 1, %s1442_s17   ;;  %s1697_s15 = smov %s1438_s16 }
 0x114   : > { %p11_p5 = scmp.ge.s32.totalorder %s14_s17, 4   ;;  %s1698_s16 = smov %s1700_s18 }
 0x116   :  { %13 = sbr.rel (!%p11_p5) target bundleno = 2 (0x2), region = 83 }

</bundles_post_ra>
